<compile_context>
chip_gen: v6e
topology: v6e:2x2x1
jax: 0.10.0
libtpu: 0.0.40
codegen_flags: <defaults>
</compile_context>

<pallas_src>
import functools

import jax
import jax.numpy as jnp
from jax.experimental import pallas as pl
from jax.experimental.pallas import tpu as pltpu

IN_DIM = 28 * 28     # 784
ENC1 = 12 * 12       # 144
ENC2 = 9 * 9         # 81
ENC3 = 5 * 5         # 25

LANE = 128
SUBLANE = 8

DIMS = [IN_DIM, ENC1, ENC2, ENC3, ENC2, ENC1, IN_DIM]


def _round_up(a, m):
    return (a + m - 1) // m * m


# Only internal widths are lane-padded; the 784-wide input/output stay unpadded.
PAD_DIMS = [d if d == IN_DIM else _round_up(d, LANE) for d in DIMS]
# -> [784, 256, 128, 128, 128, 256, 784]


def _device_kind():
    try:
        return getattr(jax.devices()[0], "device_kind", "").lower()
    except Exception:
        return ""


def _is_v5e(kind):
    return ("v5e" in kind) or ("v5 lite" in kind) or ("v5lite" in kind)


def _is_v7(kind):
    return ("v7" in kind) or ("tpu7" in kind)


def autoencoder_kernel(x_ref,
                       w1, b1, w2, b2, w3, b3, w4, b4, w5, b5, w6, b6,
                       out_ref, *, compute_dtype):
    def dense(h, w_ref, b_ref):
        # MXU matmul, f32 accumulation; operands in compute_dtype (bf16 on v5e).
        return jnp.dot(h.astype(compute_dtype), w_ref[...],
                       preferred_element_type=jnp.float32) + b_ref[...]

    h = x_ref[...]                                   # (tb, 784) f32
    h = jnp.maximum(dense(h, w1, b1), 0.0)
    h = jnp.maximum(dense(h, w2, b2), 0.0)
    h = jnp.maximum(dense(h, w3, b3), 0.0)
    h = jnp.maximum(dense(h, w4, b4), 0.0)
    h = jnp.maximum(dense(h, w5, b5), 0.0)
    out_ref[...] = jax.nn.sigmoid(dense(h, w6, b6))  # (tb, 784)


def _pad_params(params, weight_dtype):
    """Zero-pad weights/biases to the (exact-through-ReLU) padded layer widths."""
    padded = []
    for i, (w, b) in enumerate(params):
        kin, kout = DIMS[i], DIMS[i + 1]
        pin, pout = PAD_DIMS[i], PAD_DIMS[i + 1]
        wp = jnp.zeros((pin, pout), weight_dtype).at[:kin, :kout].set(
            w.astype(weight_dtype))
        bp = jnp.zeros((1, pout), jnp.float32).at[:, :kout].set(b)
        padded.append((wp, bp))
    return padded


def _const_spec(shape):
    """Constant-index BlockSpec (VMEM-resident across the grid), single-buffered."""
    idx = lambda i: (0, 0)
    try:
        return pl.BlockSpec(shape, idx, pipeline_mode=pl.Buffered(1))
    except TypeError:
        return pl.BlockSpec(shape, idx)


@functools.partial(jax.jit, static_argnames=("tb",))
def autoencoder_forward(x, params, tb=None):
    """x: (N, 784) float32. params: list of 6 (w_(in,out), b_(1,out)) tuples."""
    n = x.shape[0]
    kind = _device_kind()

    # bf16 matmul operands on v5e (bf16-native MXU), f32 elsewhere.
    compute_dtype = jnp.bfloat16 if _is_v5e(kind) else jnp.float32

    # --- batch tile ------------------------------------------------------
    if tb is None:
        if _is_v7(kind):
            # v7x: 2 TensorCores share the grid -> aim for >=4 steps, cap at 512.
            tb = min(512, _round_up(max(pl.cdiv(n, 4), 1), SUBLANE))
        else:
            # v5e/v6e: bigger tiles amortize per-step overhead; 128 MiB VMEM.
            tb = min(1024, _round_up(n, SUBLANE))
    tb = max(SUBLANE, _round_up(tb, SUBLANE))
    grid = (pl.cdiv(n, tb),)   # partial last block handled by masked writes

    # --- pad parameters to lane-dense internal widths ---------------------
    padded_params = _pad_params(params, compute_dtype)
    flat = []
    for w, b in padded_params:
        flat.extend([w, b])

    # --- block specs -------------------------------------------------------
    x_spec = pl.BlockSpec((tb, IN_DIM), lambda i: (i, 0))
    out_spec = pl.BlockSpec((tb, IN_DIM), lambda i: (i, 0))
    param_specs = []
    for w, b in padded_params:
        param_specs.append(_const_spec(w.shape))
        param_specs.append(_const_spec(b.shape))

    # --- VMEM budget: actual need + headroom, capped well below v7x's 64 MiB ---
    weight_bytes = sum(w.size * w.dtype.itemsize + b.size * b.dtype.itemsize
                       for w, b in padded_params)
    vmem_need = (4 * tb * IN_DIM * 4        # x + out tiles, double-buffered, f32
                 + weight_bytes             # single-buffered weights/biases
                 + 6 * tb * 256 * 4)        # intermediate activation headroom
    vmem_limit = int(max(32 << 20, min(48 << 20, vmem_need + (8 << 20))))

    # --- advisory cost estimate ---------------------------------------------
    flops_per_row = 2 * sum(DIMS[i] * DIMS[i + 1] for i in range(6))
    cost = pl.CostEstimate(
        flops=n * flops_per_row,
        transcendentals=n * IN_DIM,
        bytes_accessed=2 * n * IN_DIM * 4 + weight_bytes,
    )

    out = pl.pallas_call(
        functools.partial(autoencoder_kernel, compute_dtype=compute_dtype),
        out_shape=jax.ShapeDtypeStruct((n, IN_DIM), jnp.float32),
        grid=grid,
        in_specs=[x_spec] + param_specs,
        out_specs=out_spec,
        compiler_params=pltpu.CompilerParams(
            dimension_semantics=("parallel",),
            vmem_limit_bytes=vmem_limit,
        ),
        cost_estimate=cost,
    )(x, *flat)

    return out


def init_params(key):
    """Deterministic init matching nn.Linear shapes (weights stored transposed)."""
    params = []
    for i in range(6):
        fan_in, fan_out = DIMS[i], DIMS[i + 1]
        key, kw, kb = jax.random.split(key, 3)
        bound = 1.0 / jnp.sqrt(fan_in)
        # PyTorch Linear weight is (out, in); we keep the transposed (in, out).
        w = jax.random.uniform(kw, (fan_in, fan_out), jnp.float32, -bound, bound)
        b = jax.random.uniform(kb, (1, fan_out), jnp.float32, -bound, bound)
        params.append((w, b))
    return params


def reference_forward(x, params):
    h = x
    for i, (w, b) in enumerate(params):
        h = h @ w + b
        h = jnp.maximum(h, 0.0) if i < 5 else jax.nn.sigmoid(h)
    return h


if __name__ == "__main__":
    key = jax.random.PRNGKey(0)
    key, kx = jax.random.split(key)
    batch = 8
    x = jax.random.normal(kx, (batch, IN_DIM), jnp.float32)
    params = init_params(key)

    out = autoencoder_forward(x, params)
    out = jax.block_until_ready(out)

    ref = reference_forward(x, params)
    assert out.shape == (batch, IN_DIM)

    # bf16 matmul operands on v5e need a looser tolerance vs the f32 reference.
    tol = 3e-2 if _is_v5e(_device_kind()) else 1e-5
    err = jnp.max(jnp.abs(out - ref))
    assert jnp.allclose(out, ref, atol=tol, rtol=tol), f"max abs err {err}"
    print("KERNEL_OK")
</pallas_src>

<mosaic_0001>
module attributes {stable_mosaic.version = 11 : i64} {
  func.func @autoencoder_kernel(%arg0: i32, %arg1: memref<8x784xf32, #tpu.memory_space<vmem>>, %arg2: memref<784x256xf32, #tpu.memory_space<vmem>>, %arg3: memref<1x256xf32, #tpu.memory_space<vmem>>, %arg4: memref<256x128xf32, #tpu.memory_space<vmem>>, %arg5: memref<1x128xf32, #tpu.memory_space<vmem>>, %arg6: memref<128x128xf32, #tpu.memory_space<vmem>>, %arg7: memref<1x128xf32, #tpu.memory_space<vmem>>, %arg8: memref<128x128xf32, #tpu.memory_space<vmem>>, %arg9: memref<1x128xf32, #tpu.memory_space<vmem>>, %arg10: memref<128x256xf32, #tpu.memory_space<vmem>>, %arg11: memref<1x256xf32, #tpu.memory_space<vmem>>, %arg12: memref<256x784xf32, #tpu.memory_space<vmem>>, %arg13: memref<1x784xf32, #tpu.memory_space<vmem>>, %arg14: memref<8x784xf32, #tpu.memory_space<vmem>>) attributes {dimension_semantics = [#tpu.dimension_semantics<parallel>], iteration_bounds = array<i64: 1>, scalar_prefetch = 0 : i64, scratch_operands = 0 : i64, tpu.core_type = #tpu.core_type<tc>, window_params = [{transform_indices = @transform_0, window_bounds = array<i64: 8, 784>}, {pipeline_mode = #tpu.pipeline_mode<synchronous>, transform_indices = @transform_1, window_bounds = array<i64: 784, 256>}, {pipeline_mode = #tpu.pipeline_mode<synchronous>, transform_indices = @transform_2, window_bounds = array<i64: 1, 256>}, {pipeline_mode = #tpu.pipeline_mode<synchronous>, transform_indices = @transform_3, window_bounds = array<i64: 256, 128>}, {pipeline_mode = #tpu.pipeline_mode<synchronous>, transform_indices = @transform_4, window_bounds = array<i64: 1, 128>}, {pipeline_mode = #tpu.pipeline_mode<synchronous>, transform_indices = @transform_5, window_bounds = array<i64: 128, 128>}, {pipeline_mode = #tpu.pipeline_mode<synchronous>, transform_indices = @transform_6, window_bounds = array<i64: 1, 128>}, {pipeline_mode = #tpu.pipeline_mode<synchronous>, transform_indices = @transform_7, window_bounds = array<i64: 128, 128>}, {pipeline_mode = #tpu.pipeline_mode<synchronous>, transform_indices = @transform_8, window_bounds = array<i64: 1, 128>}, {pipeline_mode = #tpu.pipeline_mode<synchronous>, transform_indices = @transform_9, window_bounds = array<i64: 128, 256>}, {pipeline_mode = #tpu.pipeline_mode<synchronous>, transform_indices = @transform_10, window_bounds = array<i64: 1, 256>}, {pipeline_mode = #tpu.pipeline_mode<synchronous>, transform_indices = @transform_11, window_bounds = array<i64: 256, 784>}, {pipeline_mode = #tpu.pipeline_mode<synchronous>, transform_indices = @transform_12, window_bounds = array<i64: 1, 784>}, {transform_indices = @transform_13, window_bounds = array<i64: 8, 784>}]} {
    %c0 = arith.constant 0 : index
    %c0_0 = arith.constant 0 : index
    %0 = vector.load %arg1[%c0, %c0_0] : memref<8x784xf32, #tpu.memory_space<vmem>>, vector<8x784xf32>
    %c0_1 = arith.constant 0 : index
    %c0_2 = arith.constant 0 : index
    %1 = vector.load %arg2[%c0_1, %c0_2] : memref<784x256xf32, #tpu.memory_space<vmem>>, vector<784x256xf32>
    %cst = arith.constant dense<0.000000e+00> : vector<8x256xf32>
    %2 = tpu.matmul %0, %1, %cst {dimension_numbers = #tpu.dot_dimension_numbers<[1], [0], [0], [1], [0, 0, 1, 1], [], []>} : vector<8x784xf32>, vector<784x256xf32>, vector<8x256xf32> -> vector<8x256xf32>
    %c0_3 = arith.constant 0 : index
    %c0_4 = arith.constant 0 : index
    %3 = vector.load %arg3[%c0_3, %c0_4] : memref<1x256xf32, #tpu.memory_space<vmem>>, vector<1x256xf32>
    %4 = vector.broadcast %3 : vector<1x256xf32> to vector<8x256xf32>
    %5 = arith.addf %2, %4 : vector<8x256xf32>
    %cst_5 = arith.constant 0.000000e+00 : f32
    %6 = vector.broadcast %cst_5 : f32 to vector<8x256xf32>
    %7 = arith.maximumf %5, %6 : vector<8x256xf32>
    %c0_6 = arith.constant 0 : index
    %c0_7 = arith.constant 0 : index
    %8 = vector.load %arg4[%c0_6, %c0_7] : memref<256x128xf32, #tpu.memory_space<vmem>>, vector<256x128xf32>
    %cst_8 = arith.constant dense<0.000000e+00> : vector<8x128xf32>
    %9 = tpu.matmul %7, %8, %cst_8 {dimension_numbers = #tpu.dot_dimension_numbers<[1], [0], [0], [1], [0, 0, 1, 1], [], []>} : vector<8x256xf32>, vector<256x128xf32>, vector<8x128xf32> -> vector<8x128xf32>
    %c0_9 = arith.constant 0 : index
    %c0_10 = arith.constant 0 : index
    %10 = vector.load %arg5[%c0_9, %c0_10] : memref<1x128xf32, #tpu.memory_space<vmem>>, vector<1x128xf32>
    %11 = vector.broadcast %10 : vector<1x128xf32> to vector<8x128xf32>
    %12 = arith.addf %9, %11 : vector<8x128xf32>
    %cst_11 = arith.constant 0.000000e+00 : f32
    %13 = vector.broadcast %cst_11 : f32 to vector<8x128xf32>
    %14 = arith.maximumf %12, %13 : vector<8x128xf32>
    %c0_12 = arith.constant 0 : index
    %c0_13 = arith.constant 0 : index
    %15 = vector.load %arg6[%c0_12, %c0_13] : memref<128x128xf32, #tpu.memory_space<vmem>>, vector<128x128xf32>
    %cst_14 = arith.constant dense<0.000000e+00> : vector<8x128xf32>
    %16 = tpu.matmul %14, %15, %cst_14 {dimension_numbers = #tpu.dot_dimension_numbers<[1], [0], [0], [1], [0, 0, 1, 1], [], []>} : vector<8x128xf32>, vector<128x128xf32>, vector<8x128xf32> -> vector<8x128xf32>
    %c0_15 = arith.constant 0 : index
    %c0_16 = arith.constant 0 : index
    %17 = vector.load %arg7[%c0_15, %c0_16] : memref<1x128xf32, #tpu.memory_space<vmem>>, vector<1x128xf32>
    %18 = vector.broadcast %17 : vector<1x128xf32> to vector<8x128xf32>
    %19 = arith.addf %16, %18 : vector<8x128xf32>
    %cst_17 = arith.constant 0.000000e+00 : f32
    %20 = vector.broadcast %cst_17 : f32 to vector<8x128xf32>
    %21 = arith.maximumf %19, %20 : vector<8x128xf32>
    %c0_18 = arith.constant 0 : index
    %c0_19 = arith.constant 0 : index
    %22 = vector.load %arg8[%c0_18, %c0_19] : memref<128x128xf32, #tpu.memory_space<vmem>>, vector<128x128xf32>
    %cst_20 = arith.constant dense<0.000000e+00> : vector<8x128xf32>
    %23 = tpu.matmul %21, %22, %cst_20 {dimension_numbers = #tpu.dot_dimension_numbers<[1], [0], [0], [1], [0, 0, 1, 1], [], []>} : vector<8x128xf32>, vector<128x128xf32>, vector<8x128xf32> -> vector<8x128xf32>
    %c0_21 = arith.constant 0 : index
    %c0_22 = arith.constant 0 : index
    %24 = vector.load %arg9[%c0_21, %c0_22] : memref<1x128xf32, #tpu.memory_space<vmem>>, vector<1x128xf32>
    %25 = vector.broadcast %24 : vector<1x128xf32> to vector<8x128xf32>
    %26 = arith.addf %23, %25 : vector<8x128xf32>
    %cst_23 = arith.constant 0.000000e+00 : f32
    %27 = vector.broadcast %cst_23 : f32 to vector<8x128xf32>
    %28 = arith.maximumf %26, %27 : vector<8x128xf32>
    %c0_24 = arith.constant 0 : index
    %c0_25 = arith.constant 0 : index
    %29 = vector.load %arg10[%c0_24, %c0_25] : memref<128x256xf32, #tpu.memory_space<vmem>>, vector<128x256xf32>
    %cst_26 = arith.constant dense<0.000000e+00> : vector<8x256xf32>
    %30 = tpu.matmul %28, %29, %cst_26 {dimension_numbers = #tpu.dot_dimension_numbers<[1], [0], [0], [1], [0, 0, 1, 1], [], []>} : vector<8x128xf32>, vector<128x256xf32>, vector<8x256xf32> -> vector<8x256xf32>
    %c0_27 = arith.constant 0 : index
    %c0_28 = arith.constant 0 : index
    %31 = vector.load %arg11[%c0_27, %c0_28] : memref<1x256xf32, #tpu.memory_space<vmem>>, vector<1x256xf32>
    %32 = vector.broadcast %31 : vector<1x256xf32> to vector<8x256xf32>
    %33 = arith.addf %30, %32 : vector<8x256xf32>
    %cst_29 = arith.constant 0.000000e+00 : f32
    %34 = vector.broadcast %cst_29 : f32 to vector<8x256xf32>
    %35 = arith.maximumf %33, %34 : vector<8x256xf32>
    %c0_30 = arith.constant 0 : index
    %c0_31 = arith.constant 0 : index
    %36 = vector.load %arg12[%c0_30, %c0_31] : memref<256x784xf32, #tpu.memory_space<vmem>>, vector<256x784xf32>
    %cst_32 = arith.constant dense<0.000000e+00> : vector<8x784xf32>
    %37 = tpu.matmul %35, %36, %cst_32 {dimension_numbers = #tpu.dot_dimension_numbers<[1], [0], [0], [1], [0, 0, 1, 1], [], []>} : vector<8x256xf32>, vector<256x784xf32>, vector<8x784xf32> -> vector<8x784xf32>
    %c0_33 = arith.constant 0 : index
    %c0_34 = arith.constant 0 : index
    %38 = vector.load %arg13[%c0_33, %c0_34] : memref<1x784xf32, #tpu.memory_space<vmem>>, vector<1x784xf32>
    %39 = vector.broadcast %38 : vector<1x784xf32> to vector<8x784xf32>
    %40 = arith.addf %37, %39 : vector<8x784xf32>
    %41 = arith.negf %40 : vector<8x784xf32>
    %42 = math.exp %41 : vector<8x784xf32>
    %cst_35 = arith.constant 1.000000e+00 : f32
    %43 = vector.broadcast %cst_35 : f32 to vector<8x784xf32>
    %44 = arith.addf %43, %42 : vector<8x784xf32>
    %45 = arith.divf %43, %44 : vector<8x784xf32>
    %c0_36 = arith.constant 0 : index
    %c0_37 = arith.constant 0 : index
    %46 = vector.load %arg14[%c0_36, %c0_37] : memref<8x784xf32, #tpu.memory_space<vmem>>, vector<8x784xf32>
    tpu.vector_store %arg14[%c0_36, %c0_37], %45 {strides = array<i32>} : memref<8x784xf32, #tpu.memory_space<vmem>>, vector<8x784xf32>,
    return
  }
  func.func @transform_0(%arg0: i32) -> (i32, i32) {
    %c0_i32 = arith.constant 0 : i32
    %c0_i32_0 = arith.constant 0 : i32
    return %arg0, %c0_i32 : i32, i32
  }
  func.func @transform_1(%arg0: i32) -> (i32, i32) {
    %c0_i32 = arith.constant 0 : i32
    %c0_i32_0 = arith.constant 0 : i32
    %c0_i32_1 = arith.constant 0 : i32
    return %c0_i32, %c0_i32_0 : i32, i32
  }
  func.func @transform_2(%arg0: i32) -> (i32, i32) {
    %c0_i32 = arith.constant 0 : i32
    %c0_i32_0 = arith.constant 0 : i32
    %c0_i32_1 = arith.constant 0 : i32
    return %c0_i32, %c0_i32_0 : i32, i32
  }
  func.func @transform_3(%arg0: i32) -> (i32, i32) {
    %c0_i32 = arith.constant 0 : i32
    %c0_i32_0 = arith.constant 0 : i32
    %c0_i32_1 = arith.constant 0 : i32
    return %c0_i32, %c0_i32_0 : i32, i32
  }
  func.func @transform_4(%arg0: i32) -> (i32, i32) {
    %c0_i32 = arith.constant 0 : i32
    %c0_i32_0 = arith.constant 0 : i32
    %c0_i32_1 = arith.constant 0 : i32
    return %c0_i32, %c0_i32_0 : i32, i32
  }
  func.func @transform_5(%arg0: i32) -> (i32, i32) {
    %c0_i32 = arith.constant 0 : i32
    %c0_i32_0 = arith.constant 0 : i32
    %c0_i32_1 = arith.constant 0 : i32
    return %c0_i32, %c0_i32_0 : i32, i32
  }
  func.func @transform_6(%arg0: i32) -> (i32, i32) {
    %c0_i32 = arith.constant 0 : i32
    %c0_i32_0 = arith.constant 0 : i32
    %c0_i32_1 = arith.constant 0 : i32
    return %c0_i32, %c0_i32_0 : i32, i32
  }
  func.func @transform_7(%arg0: i32) -> (i32, i32) {
    %c0_i32 = arith.constant 0 : i32
    %c0_i32_0 = arith.constant 0 : i32
    %c0_i32_1 = arith.constant 0 : i32
    return %c0_i32, %c0_i32_0 : i32, i32
  }
  func.func @transform_8(%arg0: i32) -> (i32, i32) {
    %c0_i32 = arith.constant 0 : i32
    %c0_i32_0 = arith.constant 0 : i32
    %c0_i32_1 = arith.constant 0 : i32
    return %c0_i32, %c0_i32_0 : i32, i32
  }
  func.func @transform_9(%arg0: i32) -> (i32, i32) {
    %c0_i32 = arith.constant 0 : i32
    %c0_i32_0 = arith.constant 0 : i32
    %c0_i32_1 = arith.constant 0 : i32
    return %c0_i32, %c0_i32_0 : i32, i32
  }
  func.func @transform_10(%arg0: i32) -> (i32, i32) {
    %c0_i32 = arith.constant 0 : i32
    %c0_i32_0 = arith.constant 0 : i32
    %c0_i32_1 = arith.constant 0 : i32
    return %c0_i32, %c0_i32_0 : i32, i32
  }
  func.func @transform_11(%arg0: i32) -> (i32, i32) {
    %c0_i32 = arith.constant 0 : i32
    %c0_i32_0 = arith.constant 0 : i32
    %c0_i32_1 = arith.constant 0 : i32
    return %c0_i32, %c0_i32_0 : i32, i32
  }
  func.func @transform_12(%arg0: i32) -> (i32, i32) {
    %c0_i32 = arith.constant 0 : i32
    %c0_i32_0 = arith.constant 0 : i32
    %c0_i32_1 = arith.constant 0 : i32
    return %c0_i32, %c0_i32_0 : i32, i32
  }
  func.func @transform_13(%arg0: i32) -> (i32, i32) {
    %c0_i32 = arith.constant 0 : i32
    %c0_i32_0 = arith.constant 0 : i32
    return %arg0, %c0_i32 : i32, i32
  }
}

</mosaic_0001>

<bundles_post_ra>
// kernel: autoencoder_forward.1
= control target key start
LH: loop header
LB: loop body
LE: loop exit
PB: predicated region body
PF: predicated region fallthrough
CT: control target
= control target key end

     0   :  { %s3536_s0 = inlined_call_operand.vmem [shape: f32[8,784], index: 0, kind: input, shape index: {}]   ;;  %s3537_s1 = inlined_call_operand.vmem [shape: f32[784,256], index: 1, kind: input, shape index: {}]   ;;  %s3538_s2 = inlined_call_operand.vmem [shape: f32[1,256], index: 2, kind: input, shape index: {}]   ;;  %s3539_s3 = inlined_call_operand.vmem [shape: f32[256,128], index: 3, kind: input, shape index: {}]   ;;  %s3540_s4 = inlined_call_operand.vmem [shape: f32[1,128], index: 4, kind: input, shape index: {}]   ;;  %s3541_s5 = inlined_call_operand.vmem [shape: f32[128,128], index: 5, kind: input, shape index: {}]   ;;  %s3542_s6 = inlined_call_operand.vmem [shape: f32[1,128], index: 6, kind: input, shape index: {}]   ;;  %s3543_s7 = inlined_call_operand.vmem [shape: f32[128,128], index: 7, kind: input, shape index: {}]   ;;  %s3544_s8 = inlined_call_operand.vmem [shape: f32[1,128], index: 8, kind: input, shape index: {}]   ;;  %s3545_s9 = inlined_call_operand.vmem [shape: f32[128,256], index: 9, kind: input, shape index: {}]   ;;  %s3546_s10 = inlined_call_operand.vmem [shape: f32[1,256], index: 10, kind: input, shape index: {}]   ;;  %s3547_s11 = inlined_call_operand.vmem [shape: f32[256,784], index: 11, kind: input, shape index: {}]   ;;  %s3548_s12 = inlined_call_operand.vmem [shape: f32[1,784], index: 12, kind: input, shape index: {}]   ;;  %s3549_s13 = inlined_call_operand.hbm [shape: f32[8,784], index: 13, kind: output, shape index: {}]  }
   0x1   :  { %v83_v0 = vld [vmem:[%s3537_s1 + $0xf8] sm:$0xff]  ;;  %v82_v1 = vld [vmem:[%s3537_s1 + $0xf0] sm:$0xff]  ;;  %v81_v2 = vld [vmem:[%s3537_s1 + $0xe8] sm:$0xff] }
   0x2   :  { %264 = vmatprep.subr.mxu0 %v83_v0  ;;  %v147_v3 = vld [vmem:[%s3537_s1 + $0x2f8] sm:$0xff]  ;;  %v80_v4 = vld [vmem:[%s3537_s1 + $0xe0] sm:$0xff]  ;;  %v146_v5 = vld [vmem:[%s3537_s1 + $0x2f0] sm:$0xff] }
   0x3   :  { %265 = vmatpush1.msra.mxu0 %v82_v1  ;;  %335 = vmatprep.subr.mxu1 %v147_v3  ;;  %v79_v6 = vld [vmem:[%s3537_s1 + $0xd8] sm:$0xff]  ;;  %v145_v7 = vld [vmem:[%s3537_s1 + $0x2e8] sm:$0xff]  ;;  %v78_v8 = vld [vmem:[%s3537_s1 + $0xd0] sm:$0xff] }
   0x4   :  { %266 = vmatprep.subr.mxu0 %v81_v2  ;;  %336 = vmatpush1.msra.mxu1 %v146_v5  ;;  %v144_v9 = vld [vmem:[%s3537_s1 + $0x2e0] sm:$0xff]  ;;  %v143_v10 = vld [vmem:[%s3537_s1 + $0x2d8] sm:$0xff]  ;;  %v77_v11 = vld [vmem:[%s3537_s1 + $0xc8] sm:$0xff] }
   0x5   :  { %267 = vmatpush1.msra.mxu0 %v80_v4  ;;  %337 = vmatprep.subr.mxu1 %v145_v7  ;;  %v142_v12 = vld [vmem:[%s3537_s1 + $0x2d0] sm:$0xff]  ;;  %v76_v13 = vld [vmem:[%s3537_s1 + $0xc0] sm:$0xff]  ;;  %v141_v14 = vld [vmem:[%s3537_s1 + $0x2c8] sm:$0xff] }
   0x6   :  { %268 = vmatprep.subr.mxu0 %v79_v6  ;;  %338 = vmatpush1.msra.mxu1 %v144_v9  ;;  %v75_v15 = vld [vmem:[%s3537_s1 + $0xb8] sm:$0xff]  ;;  %v140_v16 = vld [vmem:[%s3537_s1 + $0x2c0] sm:$0xff]  ;;  %v74_v17 = vld [vmem:[%s3537_s1 + $0xb0] sm:$0xff] }
   0x7   :  { %269 = vmatpush1.msra.mxu0 %v78_v8  ;;  %339 = vmatprep.subr.mxu1 %v143_v10  ;;  %v139_v18 = vld [vmem:[%s3537_s1 + $0x2b8] sm:$0xff]  ;;  %v73_v19 = vld [vmem:[%s3537_s1 + $0xa8] sm:$0xff]  ;;  %v138_v20 = vld [vmem:[%s3537_s1 + $0x2b0] sm:$0xff] }
   0x8   :  { %270 = vmatprep.subr.mxu0 %v77_v11  ;;  %340 = vmatpush1.msra.mxu1 %v142_v12  ;;  %v72_v21 = vld [vmem:[%s3537_s1 + $0xa0] sm:$0xff]  ;;  %v137_v22 = vld [vmem:[%s3537_s1 + $0x2a8] sm:$0xff]  ;;  %v71_v23 = vld [vmem:[%s3537_s1 + $0x98] sm:$0xff] }
   0x9   :  { %271 = vmatpush1.msra.mxu0 %v76_v13  ;;  %341 = vmatprep.subr.mxu1 %v141_v14  ;;  %v136_v24 = vld [vmem:[%s3537_s1 + $0x2a0] sm:$0xff]  ;;  %v70_v25 = vld [vmem:[%s3537_s1 + $0x90] sm:$0xff]  ;;  %v135_v26 = vld [vmem:[%s3537_s1 + $0x298] sm:$0xff] }
   0xa   :  { %272 = vmatprep.subr.mxu0 %v75_v15  ;;  %342 = vmatpush1.msra.mxu1 %v140_v16  ;;  %v69_v27 = vld [vmem:[%s3537_s1 + $0x88] sm:$0xff]  ;;  %v134_v28 = vld [vmem:[%s3537_s1 + $0x290] sm:$0xff]  ;;  %v68_v29 = vld [vmem:[%s3537_s1 + $0x80] sm:$0xff] }
   0xb   :  { %273 = vmatpush1.msra.mxu0 %v74_v17  ;;  %343 = vmatprep.subr.mxu1 %v139_v18  ;;  %v133_v30 = vld [vmem:[%s3537_s1 + $0x288] sm:$0xff]  ;;  %v67_v31 = vld [vmem:[%s3537_s1 + $0x78] sm:$0xff]  ;;  %v132_v32 = vld [vmem:[%s3537_s1 + $0x280] sm:$0xff] }
   0xc   :  { %274 = vmatprep.subr.mxu0 %v73_v19  ;;  %344 = vmatpush1.msra.mxu1 %v138_v20  ;;  %v66_v33 = vld [vmem:[%s3537_s1 + $0x70] sm:$0xff]  ;;  %v131_v34 = vld [vmem:[%s3537_s1 + $0x278] sm:$0xff]  ;;  %v65_v35 = vld [vmem:[%s3537_s1 + $0x68] sm:$0xff] }
   0xd   :  { %275 = vmatpush1.msra.mxu0 %v72_v21  ;;  %345 = vmatprep.subr.mxu1 %v137_v22  ;;  %v130_v36 = vld [vmem:[%s3537_s1 + $0x270] sm:$0xff]  ;;  %v64_v37 = vld [vmem:[%s3537_s1 + $0x60] sm:$0xff]  ;;  %v129_v38 = vld [vmem:[%s3537_s1 + $0x268] sm:$0xff] }
   0xe   :  { %276 = vmatprep.subr.mxu0 %v71_v23  ;;  %346 = vmatpush1.msra.mxu1 %v136_v24  ;;  %v63_v39 = vld [vmem:[%s3537_s1 + $0x58] sm:$0xff]  ;;  %v128_v40 = vld [vmem:[%s3537_s1 + $0x260] sm:$0xff]  ;;  %v62_v41 = vld [vmem:[%s3537_s1 + $0x50] sm:$0xff] }
   0xf   :  { %277 = vmatpush1.msra.mxu0 %v70_v25  ;;  %347 = vmatprep.subr.mxu1 %v135_v26  ;;  %v127_v42 = vld [vmem:[%s3537_s1 + $0x258] sm:$0xff]  ;;  %v61_v43 = vld [vmem:[%s3537_s1 + $0x48] sm:$0xff]  ;;  %v126_v44 = vld [vmem:[%s3537_s1 + $0x250] sm:$0xff] }
  0x10   :  { %278 = vmatprep.subr.mxu0 %v69_v27  ;;  %348 = vmatpush1.msra.mxu1 %v134_v28  ;;  %v60_v45 = vld [vmem:[%s3537_s1 + $0x40] sm:$0xff]  ;;  %v125_v46 = vld [vmem:[%s3537_s1 + $0x248] sm:$0xff]  ;;  %v59_v47 = vld [vmem:[%s3537_s1 + $0x38] sm:$0xff] }
  0x11   :  { %279 = vmatpush1.msra.mxu0 %v68_v29  ;;  %349 = vmatprep.subr.mxu1 %v133_v30  ;;  %v124_v48 = vld [vmem:[%s3537_s1 + $0x240] sm:$0xff]  ;;  %v58_v49 = vld [vmem:[%s3537_s1 + $0x30] sm:$0xff]  ;;  %v123_v50 = vld [vmem:[%s3537_s1 + $0x238] sm:$0xff] }
  0x12   :  { %280 = vmatprep.subr.mxu0 %v67_v31  ;;  %350 = vmatpush1.msra.mxu1 %v132_v32  ;;  %v57_v51 = vld [vmem:[%s3537_s1 + $0x28] sm:$0xff]  ;;  %v122_v52 = vld [vmem:[%s3537_s1 + $0x230] sm:$0xff]  ;;  %v56_v53 = vld [vmem:[%s3537_s1 + $0x20] sm:$0xff] }
  0x13   :  { %281 = vmatpush1.msra.mxu0 %v66_v33  ;;  %351 = vmatprep.subr.mxu1 %v131_v34  ;;  %v121_v54 = vld [vmem:[%s3537_s1 + $0x228] sm:$0xff]  ;;  %v55_v55 = vld [vmem:[%s3537_s1 + $0x18] sm:$0xff]  ;;  %v120_v56 = vld [vmem:[%s3537_s1 + $0x220] sm:$0xff] }
  0x14   :  { %282 = vmatprep.subr.mxu0 %v65_v35  ;;  %352 = vmatpush1.msra.mxu1 %v130_v36  ;;  %v54_v57 = vld [vmem:[%s3537_s1 + $0x10] sm:$0xff]  ;;  %v119_v58 = vld [vmem:[%s3537_s1 + $0x218] sm:$0xff]  ;;  %v53_v59 = vld [vmem:[%s3537_s1 + $0x8] sm:$0xff] }
  0x15   :  { %283 = vmatpush1.msra.mxu0 %v64_v37  ;;  %353 = vmatprep.subr.mxu1 %v129_v38  ;;  %v118_v60 = vld [vmem:[%s3537_s1 + $0x210] sm:$0xff]  ;;  %v52_v61 = vld [vmem:[%s3537_s1] sm:$0xff]  ;;  %v117_v62 = vld [vmem:[%s3537_s1 + $0x208] sm:$0xff] }
  0x16   :  { %284 = vmatprep.subr.mxu0 %v63_v39  ;;  %354 = vmatpush1.msra.mxu1 %v128_v40  ;;  %v115_v63 = vld [vmem:[%s3537_s1 + $0x1f8] sm:$0xff]  ;;  %v116_v0 = vld [vmem:[%s3537_s1 + $0x200] sm:$0xff]  ;;  %v114_v1 = vld [vmem:[%s3537_s1 + $0x1f0] sm:$0xff] }
  0x17   :  { %285 = vmatpush1.msra.mxu0 %v62_v41  ;;  %355 = vmatprep.subr.mxu1 %v127_v42  ;;  %v179_v2 = vld [vmem:[%s3537_s1 + $0x3f8] sm:$0xff]  ;;  %v113_v3 = vld [vmem:[%s3537_s1 + $0x1e8] sm:$0xff]  ;;  %v178_v4 = vld [vmem:[%s3537_s1 + $0x3f0] sm:$0xff] }
  0x18   :  { %286 = vmatprep.subr.mxu0 %v61_v43  ;;  %356 = vmatpush1.msra.mxu1 %v126_v44  ;;  %v112_v5 = vld [vmem:[%s3537_s1 + $0x1e0] sm:$0xff]  ;;  %v177_v6 = vld [vmem:[%s3537_s1 + $0x3e8] sm:$0xff]  ;;  %v111_v7 = vld [vmem:[%s3537_s1 + $0x1d8] sm:$0xff] }
  0x19   :  { %287 = vmatpush1.msra.mxu0 %v60_v45  ;;  %357 = vmatprep.subr.mxu1 %v125_v46  ;;  %v176_v8 = vld [vmem:[%s3537_s1 + $0x3e0] sm:$0xff]  ;;  %v110_v9 = vld [vmem:[%s3537_s1 + $0x1d0] sm:$0xff]  ;;  %v175_v10 = vld [vmem:[%s3537_s1 + $0x3d8] sm:$0xff] }
  0x1a   :  { %288 = vmatprep.subr.mxu0 %v59_v47  ;;  %358 = vmatpush1.msra.mxu1 %v124_v48  ;;  %v109_v11 = vld [vmem:[%s3537_s1 + $0x1c8] sm:$0xff]  ;;  %v174_v12 = vld [vmem:[%s3537_s1 + $0x3d0] sm:$0xff]  ;;  %v108_v13 = vld [vmem:[%s3537_s1 + $0x1c0] sm:$0xff] }
  0x1b   :  { %289 = vmatpush1.msra.mxu0 %v58_v49  ;;  %359 = vmatprep.subr.mxu1 %v123_v50  ;;  %v173_v14 = vld [vmem:[%s3537_s1 + $0x3c8] sm:$0xff]  ;;  %v107_v15 = vld [vmem:[%s3537_s1 + $0x1b8] sm:$0xff]  ;;  %v172_v16 = vld [vmem:[%s3537_s1 + $0x3c0] sm:$0xff] }
  0x1c   :  { %290 = vmatprep.subr.mxu0 %v57_v51  ;;  %360 = vmatpush1.msra.mxu1 %v122_v52  ;;  %v106_v17 = vld [vmem:[%s3537_s1 + $0x1b0] sm:$0xff]  ;;  %v171_v18 = vld [vmem:[%s3537_s1 + $0x3b8] sm:$0xff]  ;;  %v105_v19 = vld [vmem:[%s3537_s1 + $0x1a8] sm:$0xff] }
  0x1d   :  { %291 = vmatpush1.msra.mxu0 %v56_v53  ;;  %361 = vmatprep.subr.mxu1 %v121_v54  ;;  %v170_v20 = vld [vmem:[%s3537_s1 + $0x3b0] sm:$0xff]  ;;  %v104_v21 = vld [vmem:[%s3537_s1 + $0x1a0] sm:$0xff]  ;;  %v169_v22 = vld [vmem:[%s3537_s1 + $0x3a8] sm:$0xff] }
  0x1e   :  { %292 = vmatprep.subr.mxu0 %v55_v55  ;;  %362 = vmatpush1.msra.mxu1 %v120_v56  ;;  %v103_v23 = vld [vmem:[%s3537_s1 + $0x198] sm:$0xff]  ;;  %v168_v24 = vld [vmem:[%s3537_s1 + $0x3a0] sm:$0xff]  ;;  %v102_v25 = vld [vmem:[%s3537_s1 + $0x190] sm:$0xff] }
  0x1f   :  { %293 = vmatpush1.msra.mxu0 %v54_v57  ;;  %363 = vmatprep.subr.mxu1 %v119_v58  ;;  %v167_v26 = vld [vmem:[%s3537_s1 + $0x398] sm:$0xff]  ;;  %v101_v27 = vld [vmem:[%s3537_s1 + $0x188] sm:$0xff]  ;;  %v166_v28 = vld [vmem:[%s3537_s1 + $0x390] sm:$0xff] }
  0x20   :  { %294 = vmatprep.subr.mxu0 %v53_v59  ;;  %364 = vmatpush1.msra.mxu1 %v118_v60  ;;  %v100_v29 = vld [vmem:[%s3537_s1 + $0x180] sm:$0xff]  ;;  %v165_v30 = vld [vmem:[%s3537_s1 + $0x388] sm:$0xff]  ;;  %v99_v31 = vld [vmem:[%s3537_s1 + $0x178] sm:$0xff] }
  0x21   :  { %295 = vmatpush1.msra.mxu0 %v52_v61  ;;  %365 = vmatprep.subr.mxu1 %v117_v62  ;;  %v164_v32 = vld [vmem:[%s3537_s1 + $0x380] sm:$0xff]  ;;  %v98_v33 = vld [vmem:[%s3537_s1 + $0x170] sm:$0xff]  ;;  %v163_v34 = vld [vmem:[%s3537_s1 + $0x378] sm:$0xff] }
  0x22   :  { %296 = vmatprep.subr.mxu0 %v115_v63  ;;  %366 = vmatpush1.msra.mxu1 %v116_v0  ;;  %v97_v35 = vld [vmem:[%s3537_s1 + $0x168] sm:$0xff]  ;;  %v162_v36 = vld [vmem:[%s3537_s1 + $0x370] sm:$0xff]  ;;  %v96_v37 = vld [vmem:[%s3537_s1 + $0x160] sm:$0xff] }
  0x23   :  { %297 = vmatpush2.msra.mxu0 %v114_v1  ;;  %367 = vmatprep.subr.mxu1 %v179_v2  ;;  %v161_v38 = vld [vmem:[%s3537_s1 + $0x368] sm:$0xff]  ;;  %v95_v39 = vld [vmem:[%s3537_s1 + $0x158] sm:$0xff]  ;;  %v160_v40 = vld [vmem:[%s3537_s1 + $0x360] sm:$0xff] }
  0x24   :  { %298 = vmatprep.subr.mxu0 %v113_v3  ;;  %368 = vmatpush2.msra.mxu1 %v178_v4  ;;  %v94_v41 = vld [vmem:[%s3537_s1 + $0x150] sm:$0xff]  ;;  %v159_v42 = vld [vmem:[%s3537_s1 + $0x358] sm:$0xff]  ;;  %v93_v43 = vld [vmem:[%s3537_s1 + $0x148] sm:$0xff] }
  0x25   :  { %299 = vmatpush2.msra.mxu0 %v112_v5  ;;  %369 = vmatprep.subr.mxu1 %v177_v6  ;;  %v158_v44 = vld [vmem:[%s3537_s1 + $0x350] sm:$0xff]  ;;  %v92_v45 = vld [vmem:[%s3537_s1 + $0x140] sm:$0xff]  ;;  %v157_v46 = vld [vmem:[%s3537_s1 + $0x348] sm:$0xff] }
  0x26   :  { %300 = vmatprep.subr.mxu0 %v111_v7  ;;  %370 = vmatpush2.msra.mxu1 %v176_v8  ;;  %v91_v47 = vld [vmem:[%s3537_s1 + $0x138] sm:$0xff]  ;;  %v156_v48 = vld [vmem:[%s3537_s1 + $0x340] sm:$0xff]  ;;  %v90_v49 = vld [vmem:[%s3537_s1 + $0x130] sm:$0xff] }
  0x27   :  { %301 = vmatpush2.msra.mxu0 %v110_v9  ;;  %371 = vmatprep.subr.mxu1 %v175_v10  ;;  %v155_v50 = vld [vmem:[%s3537_s1 + $0x338] sm:$0xff]  ;;  %v89_v51 = vld [vmem:[%s3537_s1 + $0x128] sm:$0xff]  ;;  %v154_v52 = vld [vmem:[%s3537_s1 + $0x330] sm:$0xff] }
  0x28   :  { %302 = vmatprep.subr.mxu0 %v109_v11  ;;  %372 = vmatpush2.msra.mxu1 %v174_v12  ;;  %v88_v53 = vld [vmem:[%s3537_s1 + $0x120] sm:$0xff]  ;;  %v153_v54 = vld [vmem:[%s3537_s1 + $0x328] sm:$0xff]  ;;  %v87_v55 = vld [vmem:[%s3537_s1 + $0x118] sm:$0xff] }
  0x29   :  { %303 = vmatpush2.msra.mxu0 %v108_v13  ;;  %373 = vmatprep.subr.mxu1 %v173_v14  ;;  %v152_v56 = vld [vmem:[%s3537_s1 + $0x320] sm:$0xff]  ;;  %v86_v57 = vld [vmem:[%s3537_s1 + $0x110] sm:$0xff]  ;;  %v151_v58 = vld [vmem:[%s3537_s1 + $0x318] sm:$0xff] }
  0x2a   :  { %304 = vmatprep.subr.mxu0 %v107_v15  ;;  %374 = vmatpush2.msra.mxu1 %v172_v16  ;;  %v85_v59 = vld [vmem:[%s3537_s1 + $0x108] sm:$0xff]  ;;  %v84_v61 = vld [vmem:[%s3537_s1 + $0x100] sm:$0xff]  ;;  %v150_v62 = vld [vmem:[%s3537_s1 + $0x310] sm:$0xff] }
  0x2b   :  { %305 = vmatpush2.msra.mxu0 %v106_v17  ;;  %375 = vmatprep.subr.mxu1 %v171_v18  ;;  %v46_v60 = vld [vmem:[%s3536_s0 + $0x8] sm:$0xff]  ;;  %v45_v63 = vld [vmem:[%s3536_s0] sm:$0xff]  ;;  %v211_v1 = vld [vmem:[%s3537_s1 + $0x4f8] sm:$0xff] }
  0x2c   :  { %306 = vmatprep.subr.mxu0 %v105_v19  ;;  %376 = vmatpush2.msra.mxu1 %v170_v20  ;;  %v149_v0 = vld [vmem:[%s3537_s1 + $0x308] sm:$0xff]  ;;  %v148_v2 = vld [vmem:[%s3537_s1 + $0x300] sm:$0xff]  ;;  %v48_v3 = vld [vmem:[%s3536_s0 + $0x18] sm:$0xff] }
  0x2d   :  { %307 = vmatpush2.msra.mxu0 %v104_v21  ;;  %377 = vmatprep.subr.mxu1 %v169_v22  ;;  %v210_v4 = vld [vmem:[%s3537_s1 + $0x4f0] sm:$0xff]  ;;  %v209_v6 = vld [vmem:[%s3537_s1 + $0x4e8] sm:$0xff]  ;;  %v208_v7 = vld [vmem:[%s3537_s1 + $0x4e0] sm:$0xff] }
  0x2e   :  { %308 = vmatprep.subr.mxu0 %v103_v23  ;;  %378 = vmatpush2.msra.mxu1 %v168_v24  ;;  %v47_v5 = vld [vmem:[%s3536_s0 + $0x10] sm:$0xff]  ;;  %v247_v8 = vld [vmem:[%s3537_s1 + $0x618] sm:$0xff]  ;;  %v245_v12 = vld [vmem:[%s3537_s1 + $0x608] sm:$0xff] }
  0x2f   :  { %309 = vmatpush2.msra.mxu0 %v102_v25  ;;  %379 = vmatprep.subr.mxu1 %v167_v26  ;;  %v207_v9 = vld [vmem:[%s3537_s1 + $0x4d8] sm:$0xff]  ;;  %v246_v10 = vld [vmem:[%s3537_s1 + $0x610] sm:$0xff] }
  0x30   :  { %310 = vmatprep.subr.mxu0 %v101_v27  ;;  %380 = vmatpush2.msra.mxu1 %v166_v28  ;;  %v206_v11 = vld [vmem:[%s3537_s1 + $0x4d0] sm:$0xff] }
  0x31   :  { %311 = vmatpush2.msra.mxu0 %v100_v29  ;;  %381 = vmatprep.subr.mxu1 %v165_v30 }
  0x32   :  { %312 = vmatprep.subr.mxu0 %v99_v31  ;;  %382 = vmatpush2.msra.mxu1 %v164_v32 }
  0x33   :  { %313 = vmatpush2.msra.mxu0 %v98_v33  ;;  %383 = vmatprep.subr.mxu1 %v163_v34 }
  0x34   :  { %314 = vmatprep.subr.mxu0 %v97_v35  ;;  %384 = vmatpush2.msra.mxu1 %v162_v36 }
  0x35   :  { %315 = vmatpush2.msra.mxu0 %v96_v37  ;;  %385 = vmatprep.subr.mxu1 %v161_v38 }
  0x36   :  { %316 = vmatprep.subr.mxu0 %v95_v39  ;;  %386 = vmatpush2.msra.mxu1 %v160_v40 }
  0x37   :  { %317 = vmatpush2.msra.mxu0 %v94_v41  ;;  %387 = vmatprep.subr.mxu1 %v159_v42 }
  0x38   :  { %318 = vmatprep.subr.mxu0 %v93_v43  ;;  %388 = vmatpush2.msra.mxu1 %v158_v44 }
  0x39   :  { %319 = vmatpush2.msra.mxu0 %v92_v45  ;;  %389 = vmatprep.subr.mxu1 %v157_v46 }
  0x3a   :  { %320 = vmatprep.subr.mxu0 %v91_v47  ;;  %390 = vmatpush2.msra.mxu1 %v156_v48 }
  0x3b   :  { %321 = vmatpush2.msra.mxu0 %v90_v49  ;;  %391 = vmatprep.subr.mxu1 %v155_v50 }
  0x3c   :  { %322 = vmatprep.subr.mxu0 %v89_v51  ;;  %392 = vmatpush2.msra.mxu1 %v154_v52 }
  0x3d   :  { %323 = vmatpush2.msra.mxu0 %v88_v53  ;;  %393 = vmatprep.subr.mxu1 %v153_v54 }
  0x3e   :  { %324 = vmatprep.subr.mxu0 %v87_v55  ;;  %394 = vmatpush2.msra.mxu1 %v152_v56 }
  0x3f   :  { %325 = vmatpush2.msra.mxu0 %v86_v57  ;;  %395 = vmatprep.subr.mxu1 %v151_v58 }
  0x40   :  { %326 = vmatprep.subr.mxu0 %v85_v59  ;;  %328 = vmatprep.mubr.f32.mxu0 %v46_v60 }
  0x41   :  { %327 = vmatpush2.msra.mxu0 %v84_v61  ;;  %396 = vmatpush2.msra.mxu1 %v150_v62 }
  0x42   :  { %329 = vmatmul.mubr.f32.vlgmr.msra.gmra.mxu0 %v45_v63  ;;  %397 = vmatprep.subr.mxu1 %v149_v0 }
  0x43   :  { %406 = vmatprep.subr.mxu0 %v211_v1  ;;  %398 = vmatpush2.msra.mxu1 %v148_v2 }
  0x44   :  { %399 = vmatprep.mubr.f32.mxu1 %v48_v3  ;;  %407 = vmatpush1.msra.mxu0 %v210_v4 }
  0x45   :  { %400 = vmatmul.mubr.f32.vlgmr.msra.gmra.mxu1 %v47_v5  ;;  %408 = vmatprep.subr.mxu0 %v209_v6 }
  0x46   :  { %18 = vsyncpa [#allocation3], 0  ;;  %409 = vmatpush1.msra.mxu0 %v208_v7  ;;  %v205_v13 = vld [vmem:[%s3537_s1 + $0x4c8] sm:$0xff]  ;;  %505 = vmatprep.subr.mxu1 %v247_v8  ;;  %v204_v15 = vld [vmem:[%s3537_s1 + $0x4c0] sm:$0xff]  ;;  %vm260_vm0 = vcmask 130048   ;;  %v1810_v22 = vmov 0.0  }
  0x47   :  { %v50_v14 = vld [vmem:[%s3536_s0 + $0x28] sm:$0xff]  ;;  %410 = vmatprep.subr.mxu0 %v207_v9  ;;  %506 = vmatpush1.msra.mxu1 %v246_v10  ;;  %v244_v16 = vld [vmem:[%s3537_s1 + $0x600] sm:$0xff]  ;;  %v203_v17 = vld [vmem:[%s3537_s1 + $0x4b8] sm:$0xff]  ;;  %vm1811_vm1 = vmmov 0  }
  0x48   :  { %411 = vmatpush1.msra.mxu0 %v206_v11  ;;  %507 = vmatprep.subr.mxu1 %v245_v12  ;;  %v202_v18 = vld [vmem:[%s3537_s1 + $0x4b0] sm:$0xff]  ;;  %v201_v20 = vld [vmem:[%s3537_s1 + $0x4a8] sm:$0xff]  ;;  %v200_v21 = vld [vmem:[%s3537_s1 + $0x4a0] sm:$0xff] }
  0x49   :  { %412 = vmatprep.subr.mxu0 %v205_v13  ;;  %470 = vmatprep.mubr.f32.mxu0 %v50_v14  ;;  %v51_v19 = vld [vmem:[%s3536_s0 + $0x30] sm:$0xff]  ;;  %v199_v23 = vld [vmem:[%s3537_s1 + $0x498] sm:$0xff]  ;;  %v197_v25 = vld [vmem:[%s3537_s1 + $0x488] sm:$0xff] }
  0x4a   :  { %413 = vmatpush1.msra.mxu0 %v204_v15  ;;  %508 = vmatpush1.msra.mxu1 %v244_v16  ;;  %v198_v24 = vld [vmem:[%s3537_s1 + $0x490] sm:$0xff]  ;;  %v196_v26 = vld [vmem:[%s3537_s1 + $0x480] sm:$0xff]  ;;  %v195_v27 = vld [vmem:[%s3537_s1 + $0x478] sm:$0xff] }
  0x4b   :  { %414 = vmatprep.subr.mxu0 %v203_v17  ;;  %541 = vmatprep.mubr.f32.mxu1 %v1810_v22  ;;  %v194_v28 = vld [vmem:[%s3537_s1 + $0x470] sm:$0xff]  ;;  %v193_v29 = vld [vmem:[%s3537_s1 + $0x468] sm:$0xff]  ;;  %v192_v30 = vld [vmem:[%s3537_s1 + $0x460] sm:$0xff] }
  0x4c   :  { %415 = vmatpush1.msra.mxu0 %v202_v18  ;;  %1572 = vmatmul.mubr.msk.f32.vlgmr.msra.gmra.mxu1 %vm260_vm0, %v51_v19  ;;  %v191_v31 = vld [vmem:[%s3537_s1 + $0x458] sm:$0xff]  ;;  %v190_v32 = vld [vmem:[%s3537_s1 + $0x450] sm:$0xff]  ;;  %v189_v33 = vld [vmem:[%s3537_s1 + $0x448] sm:$0xff] }
  0x4d   :  { %416 = vmatprep.subr.mxu0 %v201_v20  ;;  %v188_v34 = vld [vmem:[%s3537_s1 + $0x440] sm:$0xff]  ;;  %v187_v35 = vld [vmem:[%s3537_s1 + $0x438] sm:$0xff]  ;;  %v186_v36 = vld [vmem:[%s3537_s1 + $0x430] sm:$0xff] }
  0x4e   :  { %417 = vmatpush1.msra.mxu0 %v200_v21  ;;  %v185_v37 = vld [vmem:[%s3537_s1 + $0x428] sm:$0xff]  ;;  %v184_v38 = vld [vmem:[%s3537_s1 + $0x420] sm:$0xff]  ;;  %v183_v39 = vld [vmem:[%s3537_s1 + $0x418] sm:$0xff] }
  0x4f   :  { %418 = vmatprep.subr.mxu0 %v199_v23  ;;  %v182_v40 = vld [vmem:[%s3537_s1 + $0x410] sm:$0xff]  ;;  %v181_v41 = vld [vmem:[%s3537_s1 + $0x408] sm:$0xff]  ;;  %v180_v42 = vld [vmem:[%s3537_s1 + $0x400] sm:$0xff] }
  0x50   :  { %419 = vmatpush1.msra.mxu0 %v198_v24  ;;  %v243_v43 = vld [vmem:[%s3537_s1 + $0x5f8] sm:$0xff]  ;;  %v242_v44 = vld [vmem:[%s3537_s1 + $0x5f0] sm:$0xff]  ;;  %v241_v45 = vld [vmem:[%s3537_s1 + $0x5e8] sm:$0xff] }
  0x51   :  { %420 = vmatprep.subr.mxu0 %v197_v25  ;;  %v240_v46 = vld [vmem:[%s3537_s1 + $0x5e0] sm:$0xff]  ;;  %v239_v47 = vld [vmem:[%s3537_s1 + $0x5d8] sm:$0xff]  ;;  %v238_v48 = vld [vmem:[%s3537_s1 + $0x5d0] sm:$0xff] }
  0x52   :  { %421 = vmatpush1.msra.mxu0 %v196_v26  ;;  %v237_v49 = vld [vmem:[%s3537_s1 + $0x5c8] sm:$0xff]  ;;  %v236_v50 = vld [vmem:[%s3537_s1 + $0x5c0] sm:$0xff]  ;;  %v235_v51 = vld [vmem:[%s3537_s1 + $0x5b8] sm:$0xff] }
  0x53   :  { %422 = vmatprep.subr.mxu0 %v195_v27  ;;  %v234_v52 = vld [vmem:[%s3537_s1 + $0x5b0] sm:$0xff]  ;;  %v233_v53 = vld [vmem:[%s3537_s1 + $0x5a8] sm:$0xff]  ;;  %v232_v54 = vld [vmem:[%s3537_s1 + $0x5a0] sm:$0xff] }
  0x54   :  { %423 = vmatpush1.msra.mxu0 %v194_v28  ;;  %v231_v55 = vld [vmem:[%s3537_s1 + $0x598] sm:$0xff]  ;;  %v230_v56 = vld [vmem:[%s3537_s1 + $0x590] sm:$0xff]  ;;  %v229_v57 = vld [vmem:[%s3537_s1 + $0x588] sm:$0xff] }
  0x55   :  { %424 = vmatprep.subr.mxu0 %v193_v29  ;;  %v228_v58 = vld [vmem:[%s3537_s1 + $0x580] sm:$0xff]  ;;  %v227_v59 = vld [vmem:[%s3537_s1 + $0x578] sm:$0xff]  ;;  %v226_v60 = vld [vmem:[%s3537_s1 + $0x570] sm:$0xff] }
  0x56   :  { %425 = vmatpush1.msra.mxu0 %v192_v30  ;;  %v225_v61 = vld [vmem:[%s3537_s1 + $0x568] sm:$0xff]  ;;  %v224_v62 = vld [vmem:[%s3537_s1 + $0x560] sm:$0xff]  ;;  %v223_v63 = vld [vmem:[%s3537_s1 + $0x558] sm:$0xff] }
  0x57   :  { %426 = vmatprep.subr.mxu0 %v191_v31  ;;  %v222_v0 = vld [vmem:[%s3537_s1 + $0x550] sm:$0xff]  ;;  %v221_v1 = vld [vmem:[%s3537_s1 + $0x548] sm:$0xff]  ;;  %v220_v2 = vld [vmem:[%s3537_s1 + $0x540] sm:$0xff] }
  0x58   :  { %427 = vmatpush1.msra.mxu0 %v190_v32  ;;  %v219_v3 = vld [vmem:[%s3537_s1 + $0x538] sm:$0xff]  ;;  %v218_v4 = vld [vmem:[%s3537_s1 + $0x530] sm:$0xff]  ;;  %v217_v5 = vld [vmem:[%s3537_s1 + $0x528] sm:$0xff] }
  0x59   :  { %428 = vmatprep.subr.mxu0 %v189_v33  ;;  %v216_v6 = vld [vmem:[%s3537_s1 + $0x520] sm:$0xff]  ;;  %v215_v7 = vld [vmem:[%s3537_s1 + $0x518] sm:$0xff]  ;;  %v214_v8 = vld [vmem:[%s3537_s1 + $0x510] sm:$0xff] }
  0x5a   :  { %429 = vmatpush1.msra.mxu0 %v188_v34  ;;  %v213_v9 = vld [vmem:[%s3537_s1 + $0x508] sm:$0xff]  ;;  %v212_v10 = vld [vmem:[%s3537_s1 + $0x500] sm:$0xff]  ;;  %v581_v12 = vld [vmem:[%s3539_s3 + $0xf8] sm:$0xff] }
  0x5b   :  { %430 = vmatprep.subr.mxu0 %v187_v35  ;;  %v49_v11 = vld [vmem:[%s3536_s0 + $0x20] sm:$0xff]  ;;  %v565_v13 = vld [vmem:[%s3539_s3 + $0x78] sm:$0xff]  ;;  %v580_v14 = vld [vmem:[%s3539_s3 + $0xf0] sm:$0xff]  ;;  %1583 = vmatprep.subr.mxu1 %v581_v12 }
  0x5c   :  { %431 = vmatpush1.msra.mxu0 %v186_v36  ;;  %v564_v15 = vld [vmem:[%s3539_s3 + $0x70] sm:$0xff]  ;;  %1584 = vmatpush3.msra.mxu1 %v565_v13  ;;  %v579_v16 = vld [vmem:[%s3539_s3 + $0xe8] sm:$0xff]  ;;  %v578_v18 = vld [vmem:[%s3539_s3 + $0xe0] sm:$0xff] }
  0x5d   :  { %432 = vmatprep.subr.mxu0 %v185_v37  ;;  %1585 = vmatprep.subr.mxu1 %v580_v14  ;;  %v563_v17 = vld [vmem:[%s3539_s3 + $0x68] sm:$0xff]  ;;  %v562_v19 = vld [vmem:[%s3539_s3 + $0x60] sm:$0xff]  ;;  %v577_v20 = vld [vmem:[%s3539_s3 + $0xd8] sm:$0xff] }
  0x5e   :  { %433 = vmatpush1.msra.mxu0 %v184_v38  ;;  %1586 = vmatpush3.msra.mxu1 %v564_v15  ;;  %v561_v21 = vld [vmem:[%s3539_s3 + $0x58] sm:$0xff]  ;;  %v576_v23 = vld [vmem:[%s3539_s3 + $0xd0] sm:$0xff]  ;;  %v575_v25 = vld [vmem:[%s3539_s3 + $0xc8] sm:$0xff] }
  0x5f   :  { %434 = vmatprep.subr.mxu0 %v183_v39  ;;  %1587 = vmatprep.subr.mxu1 %v579_v16  ;;  %v560_v24 = vld [vmem:[%s3539_s3 + $0x50] sm:$0xff]  ;;  %v559_v26 = vld [vmem:[%s3539_s3 + $0x48] sm:$0xff]  ;;  %v574_v27 = vld [vmem:[%s3539_s3 + $0xc0] sm:$0xff] }
  0x60   :  { %435 = vmatpush1.msra.mxu0 %v182_v40  ;;  %1588 = vmatpush3.msra.mxu1 %v563_v17  ;;  %v558_v28 = vld [vmem:[%s3539_s3 + $0x40] sm:$0xff]  ;;  %v573_v29 = vld [vmem:[%s3539_s3 + $0xb8] sm:$0xff]  ;;  %v572_v31 = vld [vmem:[%s3539_s3 + $0xb0] sm:$0xff] }
  0x61   :  { %436 = vmatprep.subr.mxu0 %v181_v41  ;;  %1589 = vmatprep.subr.mxu1 %v578_v18  ;;  %v557_v30 = vld [vmem:[%s3539_s3 + $0x38] sm:$0xff]  ;;  %v556_v32 = vld [vmem:[%s3539_s3 + $0x30] sm:$0xff]  ;;  %v571_v33 = vld [vmem:[%s3539_s3 + $0xa8] sm:$0xff] }
  0x62   :  { %437 = vmatpush1.msra.mxu0 %v180_v42  ;;  %1590 = vmatpush3.msra.mxu1 %v562_v19  ;;  %v555_v34 = vld [vmem:[%s3539_s3 + $0x28] sm:$0xff]  ;;  %v570_v35 = vld [vmem:[%s3539_s3 + $0xa0] sm:$0xff]  ;;  %v569_v37 = vld [vmem:[%s3539_s3 + $0x98] sm:$0xff] }
  0x63   :  { %438 = vmatprep.subr.mxu0 %v243_v43  ;;  %1591 = vmatprep.subr.mxu1 %v577_v20  ;;  %v554_v36 = vld [vmem:[%s3539_s3 + $0x20] sm:$0xff]  ;;  %v553_v38 = vld [vmem:[%s3539_s3 + $0x18] sm:$0xff]  ;;  %v568_v39 = vld [vmem:[%s3539_s3 + $0x90] sm:$0xff] }
  0x64   :  { %439 = vmatpush2.msra.mxu0 %v242_v44  ;;  %1592 = vmatpush3.msra.mxu1 %v561_v21  ;;  %v552_v40 = vld [vmem:[%s3539_s3 + $0x10] sm:$0xff]  ;;  %v567_v41 = vld [vmem:[%s3539_s3 + $0x88] sm:$0xff]  ;;  %v566_v43 = vld [vmem:[%s3539_s3 + $0x80] sm:$0xff] }
  0x65   :  { %440 = vmatprep.subr.mxu0 %v241_v45  ;;  %1593 = vmatprep.subr.mxu1 %v576_v23  ;;  %v551_v42 = vld [vmem:[%s3539_s3 + $0x8] sm:$0xff]  ;;  %v550_v44 = vld [vmem:[%s3539_s3] sm:$0xff]  ;;  %v250_v45 = vlaneseq  ;;  %v667_v14 = vld [vmem:[%s3541_s5 + $0x38] sm:$0xff] }
  0x66   :  { %441 = vmatpush2.msra.mxu0 %v240_v46  ;;  %1594 = vmatpush3.msra.mxu1 %v560_v24  ;;  %v669_v12 = vld [vmem:[%s3541_s5 + $0x48] sm:$0xff]  ;;  %v668_v13 = vld [vmem:[%s3541_s5 + $0x40] sm:$0xff]  ;;  %v666_v15 = vld [vmem:[%s3541_s5 + $0x30] sm:$0xff] }
  0x67   :  { %442 = vmatprep.subr.mxu0 %v239_v47  ;;  %1595 = vmatprep.subr.mxu1 %v575_v25  ;;  %v2592_v46 = vshrl.u32 %v250_v45, 7  ;;  %v665_v16 = vld [vmem:[%s3541_s5 + $0x28] sm:$0xff]  ;;  %v664_v17 = vld [vmem:[%s3541_s5 + $0x20] sm:$0xff]  ;;  %v663_v18 = vld [vmem:[%s3541_s5 + $0x18] sm:$0xff] }
  0x68   :  { %443 = vmatpush2.msra.mxu0 %v238_v48  ;;  %1596 = vmatpush3.msra.mxu1 %v559_v26  ;;  %v248_v48 = vld [vmem:[%s3538_s2] sm:$0x3]  ;;  %v662_v19 = vld [vmem:[%s3541_s5 + $0x10] sm:$0xff]  ;;  %v661_v20 = vld [vmem:[%s3541_s5 + $0x8] sm:$0xff] }
  0x69   :  { %444 = vmatprep.subr.mxu0 %v237_v49  ;;  %1597 = vmatprep.subr.mxu1 %v574_v27  ;;  %v2595_v47 = vsub.s32 0, %v2592_v46  ;;  %v2601_v49 = vsub.s32 1, %v2592_v46  ;;  %v660_v21 = vld [vmem:[%s3541_s5] sm:$0xff]  ;;  %v769_v23 = vld [vmem:[%s3543_s7 + $0x78] sm:$0xff]  ;;  %v768_v24 = vld [vmem:[%s3543_s7 + $0x70] sm:$0xff] }
  0x6a   :  { %445 = vmatpush2.msra.mxu0 %v236_v50  ;;  %1598 = vmatpush3.msra.mxu1 %v558_v28  ;;  %v767_v25 = vld [vmem:[%s3543_s7 + $0x68] sm:$0xff]  ;;  %v766_v26 = vld [vmem:[%s3543_s7 + $0x60] sm:$0xff]  ;;  %v765_v27 = vld [vmem:[%s3543_s7 + $0x58] sm:$0xff] }
  0x6b   :  { %446 = vmatprep.subr.mxu0 %v235_v51  ;;  %1599 = vmatprep.subr.mxu1 %v573_v29  ;;  %v253_v51 = vrot.slane %v248_v48, %v2595_v47  ;;  %v764_v28 = vld [vmem:[%s3543_s7 + $0x50] sm:$0xff]  ;;  %v763_v29 = vld [vmem:[%s3543_s7 + $0x48] sm:$0xff]  ;;  %v879_v45 = vld [vmem:[%s3545_s9 + $0xf8] sm:$0xff] }
  0x6c   :  { %447 = vmatpush2.msra.mxu0 %v234_v52  ;;  %1600 = vmatpush3.msra.mxu1 %v557_v30  ;;  %v257_v52 = vrot.slane %v248_v48, %v2601_v49  ;;  %v762_v30 = vld [vmem:[%s3543_s7 + $0x40] sm:$0xff]  ;;  %v878_v48 = vld [vmem:[%s3545_s9 + $0xf0] sm:$0xff] }
  0x6d   :  { %448 = vmatprep.subr.mxu0 %v233_v53  ;;  %1601 = vmatprep.subr.mxu1 %v572_v31  ;;  %v761_v31 = vld [vmem:[%s3543_s7 + $0x38] sm:$0xff] }
  0x6e   :  { %449 = vmatpush2.msra.mxu0 %v232_v54  ;;  %1602 = vmatpush3.msra.mxu1 %v556_v32  ;;  %v760_v32 = vld [vmem:[%s3543_s7 + $0x30] sm:$0xff] }
  0x6f   :  { %450 = vmatprep.subr.mxu0 %v231_v55  ;;  %1603 = vmatprep.subr.mxu1 %v571_v33  ;;  %v759_v33 = vld [vmem:[%s3543_s7 + $0x28] sm:$0xff] }
  0x70   :  { %451 = vmatpush2.msra.mxu0 %v230_v56  ;;  %1604 = vmatpush3.msra.mxu1 %v555_v34  ;;  %v758_v34 = vld [vmem:[%s3543_s7 + $0x20] sm:$0xff] }
  0x71   :  { %452 = vmatprep.subr.mxu0 %v229_v57  ;;  %1605 = vmatprep.subr.mxu1 %v570_v35  ;;  %v757_v35 = vld [vmem:[%s3543_s7 + $0x18] sm:$0xff] }
  0x72   :  { %453 = vmatpush2.msra.mxu0 %v228_v58  ;;  %1606 = vmatpush3.msra.mxu1 %v554_v36 }
  0x73   :  { %454 = vmatprep.subr.mxu0 %v227_v59  ;;  %1607 = vmatprep.subr.mxu1 %v569_v37  ;;  %v1573_v37 = vld [vmem:[%s3540_s4] ss:$0 sm:$0xff] }
  0x74   :  { %455 = vmatpush2.msra.mxu0 %v226_v60  ;;  %1608 = vmatpush3.msra.mxu1 %v553_v38 }
  0x75   :  { %456 = vmatprep.subr.mxu0 %v225_v61  ;;  %1609 = vmatprep.subr.mxu1 %v568_v39 }
  0x76   :  { %457 = vmatpush2.msra.mxu0 %v224_v62  ;;  %1610 = vmatpush3.msra.mxu1 %v552_v40 }
  0x77   :  { %458 = vmatprep.subr.mxu0 %v223_v63  ;;  %1611 = vmatprep.subr.mxu1 %v567_v41 }
  0x78   :  { %459 = vmatpush2.msra.mxu0 %v222_v0  ;;  %1612 = vmatpush3.msra.mxu1 %v551_v42  ;;  %v756_v42 = vld [vmem:[%s3543_s7 + $0x10] sm:$0xff] }
  0x79   :  { %460 = vmatprep.subr.mxu0 %v221_v1  ;;  %1613 = vmatprep.subr.mxu1 %v566_v43  ;;  %v755_v43 = vld [vmem:[%s3543_s7 + $0x8] sm:$0xff] }
  0x7a   :  { %461 = vmatpush2.msra.mxu0 %v220_v2  ;;  %1614 = vmatpush3.msra.mxu1 %v550_v44  ;;  %v754_v44 = vld [vmem:[%s3543_s7] sm:$0xff] }
  0x7b   :  { %462 = vmatprep.subr.mxu0 %v219_v3  ;;  %1687 = vmatprep.subr.mxu1 %v1810_v22 }
  0x7c   :  { %463 = vmatpush2.msra.mxu0 %v218_v4 }
  0x7d   :  { %464 = vmatprep.subr.mxu0 %v217_v5 }
  0x7e   :  { %465 = vmatpush2.msra.mxu0 %v216_v6  ;;  %v675_v6 = vld [vmem:[%s3541_s5 + $0x78] sm:$0xff] }
  0x7f   :  { %466 = vmatprep.subr.mxu0 %v215_v7  ;;  %v674_v7 = vld [vmem:[%s3541_s5 + $0x70] sm:$0xff] }
  0x80   :  { %467 = vmatpush2.msra.mxu0 %v214_v8  ;;  %v673_v8 = vld [vmem:[%s3541_s5 + $0x68] sm:$0xff] }
  0x81   :  { %468 = vmatprep.subr.mxu0 %v213_v9  ;;  %v672_v9 = vld [vmem:[%s3541_s5 + $0x60] sm:$0xff] }
  0x82   :  { %469 = vmatpush2.msra.mxu0 %v212_v10  ;;  %v671_v10 = vld [vmem:[%s3541_s5 + $0x58] sm:$0xff] }
  0x83   :  { %471 = vmatmul.mubr.f32.vlgmr.msra.gmra.mxu0 %v49_v11  ;;  %1722 = vmatprep.subr.mxu0 %v1810_v22  ;;  %v670_v11 = vld [vmem:[%s3541_s5 + $0x50] sm:$0xff] }
  0x84   :  { %1754 = vmatprep.mubr.msk.f32.mxu0 %vm1811_vm1, %v1810_v22  ;;  %1723 = vmatpush3.msra.mxu0 %v769_v23  ;;  %v1070_v23 = vld [vmem:[%s3547_s11 + $0x348] sm:$0xff] }
  0x85   :  { %1724 = vmatprep.subr.mxu0 %v1810_v22 }
  0x86   :  { %1725 = vmatpush3.msra.mxu0 %v768_v24  ;;  %v1064_v24 = vld [vmem:[%s3547_s11 + $0x318] sm:$0xff] }
  0x87   :  { %1726 = vmatprep.subr.mxu0 %v1810_v22 }
  0x88   :  { %1727 = vmatpush3.msra.mxu0 %v767_v25  ;;  %v1063_v25 = vld [vmem:[%s3547_s11 + $0x310] sm:$0xff] }
  0x89   :  { %1728 = vmatprep.subr.mxu0 %v1810_v22 }
  0x8a   :  { %1729 = vmatpush3.msra.mxu0 %v766_v26  ;;  %v1057_v26 = vld [vmem:[%s3547_s11 + $0x2e0] sm:$0xff] }
  0x8b   :  { %1730 = vmatprep.subr.mxu0 %v1810_v22 }
  0x8c   :  { %1731 = vmatpush3.msra.mxu0 %v765_v27  ;;  %v1056_v27 = vld [vmem:[%s3547_s11 + $0x2d8] sm:$0xff] }
  0x8d   :  { %1732 = vmatprep.subr.mxu0 %v1810_v22 }
  0x8e   :  { %1733 = vmatpush3.msra.mxu0 %v764_v28  ;;  %v1050_v28 = vld [vmem:[%s3547_s11 + $0x2a8] sm:$0xff] }
  0x8f   :  { %1734 = vmatprep.subr.mxu0 %v1810_v22 }
  0x90   :  { %1735 = vmatpush3.msra.mxu0 %v763_v29  ;;  %v1049_v29 = vld [vmem:[%s3547_s11 + $0x2a0] sm:$0xff] }
  0x91   :  { %1736 = vmatprep.subr.mxu0 %v1810_v22 }
  0x92   :  { %1737 = vmatpush3.msra.mxu0 %v762_v30  ;;  %v1043_v30 = vld [vmem:[%s3547_s11 + $0x270] sm:$0xff] }
  0x93   :  { %1738 = vmatprep.subr.mxu0 %v1810_v22 }
  0x94   :  { %1739 = vmatpush3.msra.mxu0 %v761_v31  ;;  %v1042_v31 = vld [vmem:[%s3547_s11 + $0x268] sm:$0xff] }
  0x95   :  { %1740 = vmatprep.subr.mxu0 %v1810_v22 }
  0x96   :  { %1741 = vmatpush3.msra.mxu0 %v760_v32  ;;  %v1036_v32 = vld [vmem:[%s3547_s11 + $0x238] sm:$0xff] }
  0x97   :  { %1742 = vmatprep.subr.mxu0 %v1810_v22 }
  0x98   :  { %1743 = vmatpush3.msra.mxu0 %v759_v33  ;;  %v1035_v33 = vld [vmem:[%s3547_s11 + $0x230] sm:$0xff] }
  0x99   :  { %1744 = vmatprep.subr.mxu0 %v1810_v22 }
  0x9a   :  { %1745 = vmatpush3.msra.mxu0 %v758_v34  ;;  %v1029_v34 = vld [vmem:[%s3547_s11 + $0x200] sm:$0xff] }
  0x9b   :  { %1746 = vmatprep.subr.mxu0 %v1810_v22 }
  0x9c   :  { %1747 = vmatpush3.msra.mxu0 %v757_v35  ;;  %v1028_v35 = vld [vmem:[%s3547_s11 + $0x1f8] sm:$0xff] }
  0x9d   :  { %1748 = vmatprep.subr.mxu0 %v1810_v22 }
  0x9e   :  { %1749 = vmatpush3.msra.mxu0 %v756_v42  ;;  %v1001_v42 = vld [vmem:[%s3547_s11 + $0x120] sm:$0xff] }
  0x9f   :  { %1750 = vmatprep.subr.mxu0 %v1810_v22 }
  0xa0   :  { %1751 = vmatpush3.msra.mxu0 %v755_v43  ;;  %v1000_v43 = vld [vmem:[%s3547_s11 + $0x118] sm:$0xff] }
  0xa1   :  { %1752 = vmatprep.subr.mxu0 %v1810_v22 }
  0xa2   :  { %1753 = vmatpush3.msra.mxu0 %v754_v44  ;;  %v994_v44 = vld [vmem:[%s3547_s11 + $0xe8] sm:$0xff] }
 0x102   :  { %v330_v50 = vpop.f32.mrf.mxu0 }
 0x103   :  { %v331_v55 = vadd.f32 %v330_v50, %v253_v51  ;;  %v877_v50 = vld [vmem:[%s3545_s9 + $0xe8] sm:$0xff]  ;;  %v875_v51 = vld [vmem:[%s3545_s9 + $0xd8] sm:$0xff] }
 0x104   :  { %v332_v53 = vpop.f32.mrf.mxu0 }
 0x105   :  { %v401_v54 = vpop.f32.mrf.mxu1  ;;  %v333_v56 = vadd.f32 %v332_v53, %v257_v52  ;;  %v874_v52 = vld [vmem:[%s3545_s9 + $0xd0] sm:$0xff]  ;;  %v873_v53 = vld [vmem:[%s3545_s9 + $0xc8] sm:$0xff] }
 0x106   :  { %v402_v58 = vadd.f32 %v401_v54, %v331_v55  ;;  %v872_v54 = vld [vmem:[%s3545_s9 + $0xc0] sm:$0xff]  ;;  %v871_v55 = vld [vmem:[%s3545_s9 + $0xb8] sm:$0xff] }
 0x107   :  { %v403_v57 = vpop.f32.mrf.mxu1 }
 0x108   :  { %v404_v61 = vadd.f32 %v403_v57, %v333_v56  ;;  %v870_v56 = vld [vmem:[%s3545_s9 + $0xb0] sm:$0xff]  ;;  %v869_v57 = vld [vmem:[%s3545_s9 + $0xa8] sm:$0xff] }
 0x10c   :  { %v543_v60 = vpop.f32.mrf.mxu1 }
 0x10e   :  { %v545_v2 = vpop.f32.mrf.mxu1 }
 0x143   :  { %v472_v59 = vpop.f32.mrf.mxu0 }
 0x144   :  { %v473_v62 = vadd.f32 %v472_v59, %v402_v58  ;;  %v868_v58 = vld [vmem:[%s3545_s9 + $0xa0] sm:$0xff]  ;;  %v867_v59 = vld [vmem:[%s3545_s9 + $0x98] sm:$0xff] }
 0x145   :  { %v474_v63 = vpop.f32.mrf.mxu0 }
 0x146   :  { %v475_v0 = vadd.f32 %v474_v63, %v404_v61  ;;  %v544_v1 = vadd.f32 %v543_v60, %v473_v62  ;;  %v866_v60 = vld [vmem:[%s3545_s9 + $0x90] sm:$0xff]  ;;  %v865_v61 = vld [vmem:[%s3545_s9 + $0x88] sm:$0xff]  ;;  %v864_v62 = vld [vmem:[%s3545_s9 + $0x80] sm:$0xff] }
 0x147   :  { %v863_v63 = vld [vmem:[%s3545_s9 + $0x78] sm:$0xff] }
 0x148   :  { %v546_v3 = vadd.f32 %v545_v2, %v475_v0  ;;  %v548_v5 = vmax.f32 %v544_v1, 0.0  ;;  %v862_v0 = vld [vmem:[%s3545_s9 + $0x70] sm:$0xff]  ;;  %v861_v1 = vld [vmem:[%s3545_s9 + $0x68] sm:$0xff]  ;;  %v860_v2 = vld [vmem:[%s3545_s9 + $0x60] sm:$0xff] }
 0x14a   :  { %v549_v4 = vmax.f32 %v546_v3, 0.0  ;;  %v859_v3 = vld [vmem:[%s3545_s9 + $0x58] sm:$0xff] }
 0x14c   :  { %653 = vmatprep.mubr.f32.mxu1 %v549_v4  ;;  %v858_v4 = vld [vmem:[%s3545_s9 + $0x50] sm:$0xff] }
 0x14d   :  { %654 = vmatmul.mubr.f32.vlgmr.msra.gmra.mxu1 %v548_v5  ;;  %v857_v5 = vld [vmem:[%s3545_s9 + $0x48] sm:$0xff] }
 0x14e   :  { %1688 = vmatpush3.msra.mxu1 %v675_v6  ;;  %1719 = vmatprep.mubr.msk.f32.mxu1 %vm1811_vm1, %v1810_v22  ;;  %v856_v6 = vld [vmem:[%s3545_s9 + $0x40] sm:$0xff] }
 0x14f   :  { %1689 = vmatprep.subr.mxu1 %v1810_v22 }
 0x150   :  { %1690 = vmatpush3.msra.mxu1 %v674_v7  ;;  %v855_v7 = vld [vmem:[%s3545_s9 + $0x38] sm:$0xff] }
 0x151   :  { %1691 = vmatprep.subr.mxu1 %v1810_v22 }
 0x152   :  { %1692 = vmatpush3.msra.mxu1 %v673_v8  ;;  %v854_v8 = vld [vmem:[%s3545_s9 + $0x30] sm:$0xff] }
 0x153   :  { %1693 = vmatprep.subr.mxu1 %v1810_v22 }
 0x154   :  { %1694 = vmatpush3.msra.mxu1 %v672_v9  ;;  %v853_v9 = vld [vmem:[%s3545_s9 + $0x28] sm:$0xff] }
 0x155   :  { %1695 = vmatprep.subr.mxu1 %v1810_v22 }
 0x156   :  { %1696 = vmatpush3.msra.mxu1 %v671_v10  ;;  %v1574_v10 = vld [vmem:[%s3542_s6] ss:$0 sm:$0xff] }
 0x157   :  { %1697 = vmatprep.subr.mxu1 %v1810_v22 }
 0x158   :  { %1698 = vmatpush3.msra.mxu1 %v670_v11 }
 0x159   :  { %1699 = vmatprep.subr.mxu1 %v1810_v22 }
 0x15a   :  { %1700 = vmatpush3.msra.mxu1 %v669_v12 }
 0x15b   :  { %1701 = vmatprep.subr.mxu1 %v1810_v22 }
 0x15c   :  { %1702 = vmatpush3.msra.mxu1 %v668_v13 }
 0x15d   :  { %1703 = vmatprep.subr.mxu1 %v1810_v22 }
 0x15e   :  { %1704 = vmatpush3.msra.mxu1 %v667_v14 }
 0x15f   :  { %1705 = vmatprep.subr.mxu1 %v1810_v22 }
 0x160   :  { %1706 = vmatpush3.msra.mxu1 %v666_v15  ;;  %v852_v15 = vld [vmem:[%s3545_s9 + $0x20] sm:$0xff] }
 0x161   :  { %1707 = vmatprep.subr.mxu1 %v1810_v22 }
 0x162   :  { %1708 = vmatpush3.msra.mxu1 %v665_v16  ;;  %v851_v16 = vld [vmem:[%s3545_s9 + $0x18] sm:$0xff] }
 0x163   :  { %1709 = vmatprep.subr.mxu1 %v1810_v22 }
 0x164   :  { %1710 = vmatpush3.msra.mxu1 %v664_v17  ;;  %v850_v17 = vld [vmem:[%s3545_s9 + $0x10] sm:$0xff] }
 0x165   :  { %1711 = vmatprep.subr.mxu1 %v1810_v22 }
 0x166   :  { %1712 = vmatpush3.msra.mxu1 %v663_v18  ;;  %v849_v18 = vld [vmem:[%s3545_s9 + $0x8] sm:$0xff] }
 0x167   :  { %1713 = vmatprep.subr.mxu1 %v1810_v22 }
 0x168   :  { %1714 = vmatpush3.msra.mxu1 %v662_v19  ;;  %v848_v19 = vld [vmem:[%s3545_s9] sm:$0xff] }
 0x169   :  { %1715 = vmatprep.subr.mxu1 %v1810_v22 }
 0x16a   :  { %1716 = vmatpush3.msra.mxu1 %v661_v20  ;;  %v1071_v20 = vld [vmem:[%s3547_s11 + $0x350] sm:$0xff] }
 0x16b   :  { %1717 = vmatprep.subr.mxu1 %v1810_v22  ;;  %1226 = vmatprep.subr.mxu0 %v1071_v20 }
 0x16c   :  { %1718 = vmatpush3.msra.mxu1 %v660_v21  ;;  %v1073_v21 = vld [vmem:[%s3547_s11 + $0x360] sm:$0xff] }
 0x16d   :  { %892 = vmatprep.subr.mxu1 %v879_v45  ;;  %v993_v45 = vld [vmem:[%s3547_s11 + $0xe0] sm:$0xff] }
 0x20d   :  { %v1615_v36 = vpop.f32.mrf.mxu1 }
 0x20f   :  { %v1616_v38 = vpop.f32.mrf.mxu1 }
 0x210   :  { %v1617_v39 = vadd.f32 %v1616_v38, %v1615_v36  ;;  %v1022_v36 = vld [vmem:[%s3547_s11 + $0x1c8] sm:$0xff]  ;;  %v1015_v38 = vld [vmem:[%s3547_s11 + $0x190] sm:$0xff] }
 0x212   :  { %v656_v40 = vadd.f32 %v1617_v39, %v1573_v37  ;;  %v1021_v37 = vld [vmem:[%s3547_s11 + $0x1c0] sm:$0xff]  ;;  %v1014_v39 = vld [vmem:[%s3547_s11 + $0x188] sm:$0xff] }
 0x214   :  { %v659_v41 = vmax.f32 %v656_v40, 0.0  ;;  %v1008_v40 = vld [vmem:[%s3547_s11 + $0x158] sm:$0xff] }
 0x216   :  { %1720 = vmatmul.mubr.f32.vlgmr.msra.gmra.mxu1 %v659_v41  ;;  %v1007_v41 = vld [vmem:[%s3547_s11 + $0x150] sm:$0xff] }
 0x217   :  { %956 = vmatprep.mubr.f32.mxu1 %v1810_v22  ;;  %v876_v22 = vld [vmem:[%s3545_s9 + $0xe0] sm:$0xff]  ;;  %893 = vmatpush1.msra.mxu1 %v878_v48  ;;  %v987_v48 = vld [vmem:[%s3547_s11 + $0xb0] sm:$0xff] }
 0x218   :  { %894 = vmatprep.subr.mxu1 %v877_v50  ;;  %v986_v50 = vld [vmem:[%s3547_s11 + $0xa8] sm:$0xff] }
 0x219   :  { %895 = vmatpush1.msra.mxu1 %v876_v22  ;;  %v980_v22 = vld [vmem:[%s3547_s11 + $0x78] sm:$0xff] }
 0x21a   :  { %896 = vmatprep.subr.mxu1 %v875_v51  ;;  %v979_v51 = vld [vmem:[%s3547_s11 + $0x70] sm:$0xff] }
 0x21b   :  { %897 = vmatpush1.msra.mxu1 %v874_v52  ;;  %v973_v52 = vld [vmem:[%s3547_s11 + $0x40] sm:$0xff] }
 0x21c   :  { %898 = vmatprep.subr.mxu1 %v873_v53  ;;  %v972_v53 = vld [vmem:[%s3547_s11 + $0x38] sm:$0xff] }
 0x21d   :  { %899 = vmatpush1.msra.mxu1 %v872_v54  ;;  %v966_v54 = vld [vmem:[%s3547_s11 + $0x8] sm:$0xff] }
 0x21e   :  { %900 = vmatprep.subr.mxu1 %v871_v55  ;;  %v965_v55 = vld [vmem:[%s3547_s11] sm:$0xff] }
 0x21f   :  { %901 = vmatpush1.msra.mxu1 %v870_v56  ;;  %v1183_v56 = vld [vmem:[%s3547_s11 + $0x6d0] sm:$0xff] }
 0x220   :  { %902 = vmatprep.subr.mxu1 %v869_v57  ;;  %v1182_v57 = vld [vmem:[%s3547_s11 + $0x6c8] sm:$0xff] }
 0x221   :  { %903 = vmatpush1.msra.mxu1 %v868_v58  ;;  %v1176_v58 = vld [vmem:[%s3547_s11 + $0x698] sm:$0xff] }
 0x222   :  { %904 = vmatprep.subr.mxu1 %v867_v59  ;;  %v1175_v59 = vld [vmem:[%s3547_s11 + $0x690] sm:$0xff] }
 0x223   :  { %905 = vmatpush1.msra.mxu1 %v866_v60  ;;  %v1169_v60 = vld [vmem:[%s3547_s11 + $0x660] sm:$0xff] }
 0x224   :  { %906 = vmatprep.subr.mxu1 %v865_v61  ;;  %v1168_v61 = vld [vmem:[%s3547_s11 + $0x658] sm:$0xff] }
 0x225   :  { %907 = vmatpush1.msra.mxu1 %v864_v62  ;;  %v1162_v62 = vld [vmem:[%s3547_s11 + $0x628] sm:$0xff] }
 0x226   :  { %908 = vmatprep.subr.mxu1 %v863_v63  ;;  %v1161_v63 = vld [vmem:[%s3547_s11 + $0x620] sm:$0xff] }
 0x227   :  { %909 = vmatpush1.msra.mxu1 %v862_v0  ;;  %v1155_v0 = vld [vmem:[%s3547_s11 + $0x5f0] sm:$0xff] }
 0x228   :  { %910 = vmatprep.subr.mxu1 %v861_v1  ;;  %v1154_v1 = vld [vmem:[%s3547_s11 + $0x5e8] sm:$0xff] }
 0x229   :  { %911 = vmatpush1.msra.mxu1 %v860_v2  ;;  %v1148_v2 = vld [vmem:[%s3547_s11 + $0x5b8] sm:$0xff] }
 0x22a   :  { %912 = vmatprep.subr.mxu1 %v859_v3  ;;  %v1147_v3 = vld [vmem:[%s3547_s11 + $0x5b0] sm:$0xff] }
 0x22b   :  { %913 = vmatpush1.msra.mxu1 %v858_v4  ;;  %v1141_v4 = vld [vmem:[%s3547_s11 + $0x580] sm:$0xff] }
 0x22c   :  { %914 = vmatprep.subr.mxu1 %v857_v5  ;;  %v1140_v5 = vld [vmem:[%s3547_s11 + $0x578] sm:$0xff] }
 0x22d   :  { %915 = vmatpush1.msra.mxu1 %v856_v6  ;;  %v1134_v6 = vld [vmem:[%s3547_s11 + $0x548] sm:$0xff] }
 0x22e   :  { %916 = vmatprep.subr.mxu1 %v855_v7  ;;  %v1133_v7 = vld [vmem:[%s3547_s11 + $0x540] sm:$0xff] }
 0x22f   :  { %917 = vmatpush1.msra.mxu1 %v854_v8  ;;  %v1127_v8 = vld [vmem:[%s3547_s11 + $0x510] sm:$0xff] }
 0x230   :  { %918 = vmatprep.subr.mxu1 %v853_v9  ;;  %v1126_v9 = vld [vmem:[%s3547_s11 + $0x508] sm:$0xff] }
 0x231   :  { %919 = vmatpush1.msra.mxu1 %v852_v15  ;;  %v1105_v15 = vld [vmem:[%s3547_s11 + $0x460] sm:$0xff] }
 0x232   :  { %920 = vmatprep.subr.mxu1 %v851_v16  ;;  %v1099_v16 = vld [vmem:[%s3547_s11 + $0x430] sm:$0xff] }
 0x233   :  { %921 = vmatpush1.msra.mxu1 %v850_v17  ;;  %v1575_v17 = vld [vmem:[%s3544_s8] ss:$0 sm:$0xff] }
 0x234   :  { %922 = vmatprep.subr.mxu1 %v849_v18 }
 0x235   :  { %923 = vmatpush1.msra.mxu1 %v848_v19 }
 0x236   :  { %1297 = vmatprep.subr.mxu1 %v1073_v21 }
 0x2d6   :  { %v749_v11 = vpop.f32.mrf.mxu1 }
 0x2d7   :  { %v750_v12 = vadd.f32 %v1574_v10, %v749_v11  ;;  %v1120_v10 = vld [vmem:[%s3547_s11 + $0x4d8] sm:$0xff]  ;;  %v1119_v11 = vld [vmem:[%s3547_s11 + $0x4d0] sm:$0xff] }
 0x2d8   :  { %v1721_v13 = vpop.f32.mrf.mxu1 }
 0x2d9   :  { %v753_v14 = vmax.f32 %v750_v12, 0.0  ;;  %v1113_v12 = vld [vmem:[%s3547_s11 + $0x4a0] sm:$0xff]  ;;  %v1112_v13 = vld [vmem:[%s3547_s11 + $0x498] sm:$0xff] }
 0x2db   :  { %1755 = vmatmul.mubr.f32.vlgmr.msra.gmra.mxu0 %v753_v14  ;;  %v1106_v14 = vld [vmem:[%s3547_s11 + $0x468] sm:$0xff] }
 0x2dc   :  { %1227 = vmatpush1.msra.mxu0 %v1070_v23  ;;  %v1072_v23 = vld [vmem:[%s3547_s11 + $0x358] sm:$0xff] }
 0x2dd   :  { %1228 = vmatprep.subr.mxu0 %v1064_v24  ;;  %v1066_v24 = vld [vmem:[%s3547_s11 + $0x328] sm:$0xff] }
 0x2de   :  { %1229 = vmatpush1.msra.mxu0 %v1063_v25  ;;  %v1065_v25 = vld [vmem:[%s3547_s11 + $0x320] sm:$0xff] }
 0x2df   :  { %1230 = vmatprep.subr.mxu0 %v1057_v26  ;;  %v1059_v26 = vld [vmem:[%s3547_s11 + $0x2f0] sm:$0xff] }
 0x2e0   :  { %1231 = vmatpush1.msra.mxu0 %v1056_v27  ;;  %v1058_v27 = vld [vmem:[%s3547_s11 + $0x2e8] sm:$0xff] }
 0x2e1   :  { %1232 = vmatprep.subr.mxu0 %v1050_v28  ;;  %v1052_v28 = vld [vmem:[%s3547_s11 + $0x2b8] sm:$0xff] }
 0x2e2   :  { %1233 = vmatpush1.msra.mxu0 %v1049_v29  ;;  %v1051_v29 = vld [vmem:[%s3547_s11 + $0x2b0] sm:$0xff] }
 0x2e3   :  { %1234 = vmatprep.subr.mxu0 %v1043_v30  ;;  %v1045_v30 = vld [vmem:[%s3547_s11 + $0x280] sm:$0xff] }
 0x2e4   :  { %1235 = vmatpush1.msra.mxu0 %v1042_v31  ;;  %v1044_v31 = vld [vmem:[%s3547_s11 + $0x278] sm:$0xff] }
 0x2e5   :  { %1236 = vmatprep.subr.mxu0 %v1036_v32  ;;  %v1038_v32 = vld [vmem:[%s3547_s11 + $0x248] sm:$0xff] }
 0x2e6   :  { %1237 = vmatpush1.msra.mxu0 %v1035_v33  ;;  %v1037_v33 = vld [vmem:[%s3547_s11 + $0x240] sm:$0xff] }
 0x2e7   :  { %1238 = vmatprep.subr.mxu0 %v1029_v34  ;;  %v1031_v34 = vld [vmem:[%s3547_s11 + $0x210] sm:$0xff] }
 0x2e8   :  { %1239 = vmatpush1.msra.mxu0 %v1028_v35  ;;  %v1030_v35 = vld [vmem:[%s3547_s11 + $0x208] sm:$0xff] }
 0x2e9   :  { %1240 = vmatprep.subr.mxu0 %v1022_v36  ;;  %v1024_v36 = vld [vmem:[%s3547_s11 + $0x1d8] sm:$0xff] }
 0x2ea   :  { %1241 = vmatpush1.msra.mxu0 %v1021_v37  ;;  %v1023_v37 = vld [vmem:[%s3547_s11 + $0x1d0] sm:$0xff] }
 0x2eb   :  { %1242 = vmatprep.subr.mxu0 %v1015_v38  ;;  %v1017_v38 = vld [vmem:[%s3547_s11 + $0x1a0] sm:$0xff] }
 0x2ec   :  { %1243 = vmatpush1.msra.mxu0 %v1014_v39  ;;  %v1016_v39 = vld [vmem:[%s3547_s11 + $0x198] sm:$0xff] }
 0x2ed   :  { %1244 = vmatprep.subr.mxu0 %v1008_v40  ;;  %v1010_v40 = vld [vmem:[%s3547_s11 + $0x168] sm:$0xff] }
 0x2ee   :  { %1245 = vmatpush1.msra.mxu0 %v1007_v41  ;;  %v1009_v41 = vld [vmem:[%s3547_s11 + $0x160] sm:$0xff] }
 0x2ef   :  { %1246 = vmatprep.subr.mxu0 %v1001_v42  ;;  %v1003_v42 = vld [vmem:[%s3547_s11 + $0x130] sm:$0xff] }
 0x2f0   :  { %1247 = vmatpush1.msra.mxu0 %v1000_v43  ;;  %v1002_v43 = vld [vmem:[%s3547_s11 + $0x128] sm:$0xff] }
 0x2f1   :  { %1248 = vmatprep.subr.mxu0 %v994_v44  ;;  %v996_v44 = vld [vmem:[%s3547_s11 + $0xf8] sm:$0xff] }
 0x2f2   :  { %1249 = vmatpush1.msra.mxu0 %v993_v45  ;;  %v995_v45 = vld [vmem:[%s3547_s11 + $0xf0] sm:$0xff] }
 0x2f3   :  { %1250 = vmatprep.subr.mxu0 %v987_v48  ;;  %v989_v48 = vld [vmem:[%s3547_s11 + $0xc0] sm:$0xff] }
 0x2f4   :  { %1251 = vmatpush1.msra.mxu0 %v986_v50  ;;  %v988_v50 = vld [vmem:[%s3547_s11 + $0xb8] sm:$0xff] }
 0x2f5   :  { %1252 = vmatprep.subr.mxu0 %v980_v22  ;;  %v982_v22 = vld [vmem:[%s3547_s11 + $0x88] sm:$0xff] }
 0x2f6   :  { %1253 = vmatpush1.msra.mxu0 %v979_v51  ;;  %v981_v51 = vld [vmem:[%s3547_s11 + $0x80] sm:$0xff] }
 0x2f7   :  { %1254 = vmatprep.subr.mxu0 %v973_v52  ;;  %v975_v52 = vld [vmem:[%s3547_s11 + $0x50] sm:$0xff] }
 0x2f8   :  { %1255 = vmatpush1.msra.mxu0 %v972_v53  ;;  %v974_v53 = vld [vmem:[%s3547_s11 + $0x48] sm:$0xff] }
 0x2f9   :  { %1256 = vmatprep.subr.mxu0 %v966_v54  ;;  %v968_v54 = vld [vmem:[%s3547_s11 + $0x18] sm:$0xff] }
 0x2fa   :  { %1257 = vmatpush1.msra.mxu0 %v965_v55  ;;  %v967_v55 = vld [vmem:[%s3547_s11 + $0x10] sm:$0xff] }
 0x2fb   :  { %1258 = vmatprep.subr.mxu0 %v1183_v56  ;;  %v1185_v56 = vld [vmem:[%s3547_s11 + $0x6e0] sm:$0xff] }
 0x2fc   :  { %1259 = vmatpush2.msra.mxu0 %v1182_v57  ;;  %v1184_v57 = vld [vmem:[%s3547_s11 + $0x6d8] sm:$0xff] }
 0x2fd   :  { %1260 = vmatprep.subr.mxu0 %v1176_v58  ;;  %v1178_v58 = vld [vmem:[%s3547_s11 + $0x6a8] sm:$0xff] }
 0x2fe   :  { %1261 = vmatpush2.msra.mxu0 %v1175_v59  ;;  %v1177_v59 = vld [vmem:[%s3547_s11 + $0x6a0] sm:$0xff] }
 0x2ff   :  { %1262 = vmatprep.subr.mxu0 %v1169_v60  ;;  %v1171_v60 = vld [vmem:[%s3547_s11 + $0x670] sm:$0xff] }
 0x300   :  { %1263 = vmatpush2.msra.mxu0 %v1168_v61  ;;  %v1170_v61 = vld [vmem:[%s3547_s11 + $0x668] sm:$0xff] }
 0x301   :  { %1264 = vmatprep.subr.mxu0 %v1162_v62  ;;  %v1164_v62 = vld [vmem:[%s3547_s11 + $0x638] sm:$0xff] }
 0x302   :  { %1265 = vmatpush2.msra.mxu0 %v1161_v63  ;;  %v1163_v63 = vld [vmem:[%s3547_s11 + $0x630] sm:$0xff] }
 0x303   :  { %1266 = vmatprep.subr.mxu0 %v1155_v0  ;;  %v1157_v0 = vld [vmem:[%s3547_s11 + $0x600] sm:$0xff] }
 0x304   :  { %1267 = vmatpush2.msra.mxu0 %v1154_v1  ;;  %v1156_v1 = vld [vmem:[%s3547_s11 + $0x5f8] sm:$0xff] }
 0x305   :  { %1268 = vmatprep.subr.mxu0 %v1148_v2  ;;  %v1150_v2 = vld [vmem:[%s3547_s11 + $0x5c8] sm:$0xff] }
 0x306   :  { %1269 = vmatpush2.msra.mxu0 %v1147_v3  ;;  %v1149_v3 = vld [vmem:[%s3547_s11 + $0x5c0] sm:$0xff] }
 0x307   :  { %1270 = vmatprep.subr.mxu0 %v1141_v4  ;;  %v1143_v4 = vld [vmem:[%s3547_s11 + $0x590] sm:$0xff] }
 0x308   :  { %1271 = vmatpush2.msra.mxu0 %v1140_v5  ;;  %v1142_v5 = vld [vmem:[%s3547_s11 + $0x588] sm:$0xff] }
 0x309   :  { %1272 = vmatprep.subr.mxu0 %v1134_v6  ;;  %v1136_v6 = vld [vmem:[%s3547_s11 + $0x558] sm:$0xff] }
 0x30a   :  { %1273 = vmatpush2.msra.mxu0 %v1133_v7  ;;  %v1135_v7 = vld [vmem:[%s3547_s11 + $0x550] sm:$0xff] }
 0x30b   :  { %1274 = vmatprep.subr.mxu0 %v1127_v8  ;;  %v1129_v8 = vld [vmem:[%s3547_s11 + $0x520] sm:$0xff] }
 0x30c   :  { %1275 = vmatpush2.msra.mxu0 %v1126_v9  ;;  %v1128_v9 = vld [vmem:[%s3547_s11 + $0x518] sm:$0xff] }
 0x30d   :  { %1276 = vmatprep.subr.mxu0 %v1120_v10  ;;  %v1122_v10 = vld [vmem:[%s3547_s11 + $0x4e8] sm:$0xff] }
 0x30e   :  { %1277 = vmatpush2.msra.mxu0 %v1119_v11  ;;  %v1121_v11 = vld [vmem:[%s3547_s11 + $0x4e0] sm:$0xff] }
 0x30f   :  { %1278 = vmatprep.subr.mxu0 %v1113_v12  ;;  %v1115_v12 = vld [vmem:[%s3547_s11 + $0x4b0] sm:$0xff] }
 0x310   :  { %1279 = vmatpush2.msra.mxu0 %v1112_v13  ;;  %v1114_v13 = vld [vmem:[%s3547_s11 + $0x4a8] sm:$0xff] }
 0x311   :  { %1280 = vmatprep.subr.mxu0 %v1106_v14  ;;  %v1108_v14 = vld [vmem:[%s3547_s11 + $0x478] sm:$0xff] }
 0x312   :  { %1281 = vmatpush2.msra.mxu0 %v1105_v15  ;;  %v1107_v15 = vld [vmem:[%s3547_s11 + $0x470] sm:$0xff] }
 0x313   :  { %1282 = vmatprep.subr.mxu0 %v1099_v16  ;;  %v1101_v16 = vld [vmem:[%s3547_s11 + $0x440] sm:$0xff] }
 0x39b   :  { %v843_v18 = vpop.f32.mrf.mxu0 }
 0x39c   :  { %v844_v19 = vadd.f32 %v1575_v17, %v843_v18  ;;  %v1098_v17 = vld [vmem:[%s3547_s11 + $0x428] sm:$0xff]  ;;  %v1100_v18 = vld [vmem:[%s3547_s11 + $0x438] sm:$0xff] }
 0x39d   :  { %v1756_v20 = vpop.f32.mrf.mxu0  ;;  %1283 = vmatpush2.msra.mxu0 %v1098_v17  ;;  %v1011_v17 = vld [vmem:[%s3547_s11 + $0x170] sm:$0xff] }
 0x39e   :  { %v847_v21 = vmax.f32 %v844_v19, 0.0  ;;  %v1092_v19 = vld [vmem:[%s3547_s11 + $0x3f8] sm:$0xff]  ;;  %v1094_v20 = vld [vmem:[%s3547_s11 + $0x408] sm:$0xff] }
 0x39f   :  { %1284 = vmatprep.subr.mxu0 %v1092_v19  ;;  %v1005_v19 = vld [vmem:[%s3547_s11 + $0x140] sm:$0xff] }
 0x3a0   :  { %957 = vmatmul.mubr.f32.vlgmr.msra.gmra.mxu1 %v847_v21  ;;  %v1091_v21 = vld [vmem:[%s3547_s11 + $0x3f0] sm:$0xff] }
 0x3a1   :  { %1298 = vmatpush1.msra.mxu1 %v1072_v23  ;;  %v1093_v23 = vld [vmem:[%s3547_s11 + $0x400] sm:$0xff]  ;;  %1285 = vmatpush2.msra.mxu0 %v1091_v21  ;;  %v1004_v21 = vld [vmem:[%s3547_s11 + $0x138] sm:$0xff] }
 0x3a2   :  { %1299 = vmatprep.subr.mxu1 %v1066_v24  ;;  %v1085_v24 = vld [vmem:[%s3547_s11 + $0x3c0] sm:$0xff] }
 0x3a3   :  { %1300 = vmatpush1.msra.mxu1 %v1065_v25  ;;  %v1087_v25 = vld [vmem:[%s3547_s11 + $0x3d0] sm:$0xff]  ;;  %1286 = vmatprep.subr.mxu0 %v1085_v24  ;;  %v998_v24 = vld [vmem:[%s3547_s11 + $0x108] sm:$0xff] }
 0x3a4   :  { %1301 = vmatprep.subr.mxu1 %v1059_v26  ;;  %v1084_v26 = vld [vmem:[%s3547_s11 + $0x3b8] sm:$0xff] }
 0x3a5   :  { %1302 = vmatpush1.msra.mxu1 %v1058_v27  ;;  %v1086_v27 = vld [vmem:[%s3547_s11 + $0x3c8] sm:$0xff]  ;;  %1287 = vmatpush2.msra.mxu0 %v1084_v26  ;;  %v997_v26 = vld [vmem:[%s3547_s11 + $0x100] sm:$0xff] }
 0x3a6   :  { %1303 = vmatprep.subr.mxu1 %v1052_v28  ;;  %v1078_v28 = vld [vmem:[%s3547_s11 + $0x388] sm:$0xff] }
 0x3a7   :  { %1304 = vmatpush1.msra.mxu1 %v1051_v29  ;;  %v1080_v29 = vld [vmem:[%s3547_s11 + $0x398] sm:$0xff]  ;;  %1288 = vmatprep.subr.mxu0 %v1078_v28  ;;  %v991_v28 = vld [vmem:[%s3547_s11 + $0xd0] sm:$0xff] }
 0x3a8   :  { %1305 = vmatprep.subr.mxu1 %v1045_v30  ;;  %v1077_v30 = vld [vmem:[%s3547_s11 + $0x380] sm:$0xff] }
 0x3a9   :  { %1306 = vmatpush1.msra.mxu1 %v1044_v31  ;;  %v1079_v31 = vld [vmem:[%s3547_s11 + $0x390] sm:$0xff]  ;;  %1289 = vmatpush2.msra.mxu0 %v1077_v30  ;;  %v990_v30 = vld [vmem:[%s3547_s11 + $0xc8] sm:$0xff] }
 0x3aa   :  { %1307 = vmatprep.subr.mxu1 %v1038_v32  ;;  %v1075_v32 = vld [vmem:[%s3547_s11 + $0x370] sm:$0xff] }
 0x3ab   :  { %1308 = vmatpush1.msra.mxu1 %v1037_v33  ;;  %v1188_v33 = vld [vmem:[%s3547_s11 + $0x6f8] sm:$0xff]  ;;  %1368 = vmatprep.subr.mxu0 %v1075_v32 }
 0x3ac   :  { %1309 = vmatprep.subr.mxu1 %v1031_v34  ;;  %v880_v34 = vld [vmem:[%s3546_s10] sm:$0x3]  ;;  %v984_v32 = vld [vmem:[%s3547_s11 + $0x98] sm:$0xff] }
 0x3ad   :  { %1310 = vmatpush1.msra.mxu1 %v1030_v35  ;;  %v885_v35 = vrot.slane %v880_v34, %v2595_v47 }
 0x3ae   :  { %1311 = vmatprep.subr.mxu1 %v1024_v36  ;;  %v889_v36 = vrot.slane %v880_v34, %v2601_v49  ;;  %v983_v34 = vld [vmem:[%s3547_s11 + $0x90] sm:$0xff] }
 0x3af   :  { %1312 = vmatpush1.msra.mxu1 %v1023_v37 }
 0x3b0   :  { %1313 = vmatprep.subr.mxu1 %v1017_v38 }
 0x3b1   :  { %1314 = vmatpush1.msra.mxu1 %v1016_v39 }
 0x3b2   :  { %1315 = vmatprep.subr.mxu1 %v1010_v40 }
 0x3b3   :  { %1316 = vmatpush1.msra.mxu1 %v1009_v41 }
 0x3b4   :  { %1317 = vmatprep.subr.mxu1 %v1003_v42 }
 0x3b5   :  { %1318 = vmatpush1.msra.mxu1 %v1002_v43  ;;  %v1074_v43 = vld [vmem:[%s3547_s11 + $0x368] sm:$0xff] }
 0x3b6   :  { %1319 = vmatprep.subr.mxu1 %v996_v44  ;;  %v1076_v44 = vld [vmem:[%s3547_s11 + $0x378] sm:$0xff] }
 0x3b7   :  { %1320 = vmatpush1.msra.mxu1 %v995_v45  ;;  %v1068_v45 = vld [vmem:[%s3547_s11 + $0x338] sm:$0xff] }
 0x3b8   :  { %1321 = vmatprep.subr.mxu1 %v989_v48  ;;  %v1181_v48 = vld [vmem:[%s3547_s11 + $0x6c0] sm:$0xff] }
 0x3b9   :  { %1322 = vmatpush1.msra.mxu1 %v988_v50  ;;  %v1067_v50 = vld [vmem:[%s3547_s11 + $0x330] sm:$0xff] }
 0x3ba   :  { %1323 = vmatprep.subr.mxu1 %v982_v22  ;;  %v1069_v22 = vld [vmem:[%s3547_s11 + $0x340] sm:$0xff] }
 0x3bb   :  { %1324 = vmatpush1.msra.mxu1 %v981_v51  ;;  %v1061_v51 = vld [vmem:[%s3547_s11 + $0x300] sm:$0xff] }
 0x3bc   :  { %1325 = vmatprep.subr.mxu1 %v975_v52  ;;  %v1174_v52 = vld [vmem:[%s3547_s11 + $0x688] sm:$0xff] }
 0x3bd   :  { %1326 = vmatpush1.msra.mxu1 %v974_v53  ;;  %v1060_v53 = vld [vmem:[%s3547_s11 + $0x2f8] sm:$0xff] }
 0x3be   :  { %1327 = vmatprep.subr.mxu1 %v968_v54  ;;  %v1062_v54 = vld [vmem:[%s3547_s11 + $0x308] sm:$0xff] }
 0x3bf   :  { %1328 = vmatpush1.msra.mxu1 %v967_v55  ;;  %v1054_v55 = vld [vmem:[%s3547_s11 + $0x2c8] sm:$0xff] }
 0x3c0   :  { %1329 = vmatprep.subr.mxu1 %v1185_v56  ;;  %v1167_v56 = vld [vmem:[%s3547_s11 + $0x650] sm:$0xff] }
 0x3c1   :  { %1330 = vmatpush2.msra.mxu1 %v1184_v57  ;;  %v1053_v57 = vld [vmem:[%s3547_s11 + $0x2c0] sm:$0xff] }
 0x3c2   :  { %1331 = vmatprep.subr.mxu1 %v1178_v58  ;;  %v1055_v58 = vld [vmem:[%s3547_s11 + $0x2d0] sm:$0xff] }
 0x3c3   :  { %1332 = vmatpush2.msra.mxu1 %v1177_v59  ;;  %v1047_v59 = vld [vmem:[%s3547_s11 + $0x290] sm:$0xff] }
 0x3c4   :  { %1333 = vmatprep.subr.mxu1 %v1171_v60  ;;  %v1160_v60 = vld [vmem:[%s3547_s11 + $0x618] sm:$0xff] }
 0x3c5   :  { %1334 = vmatpush2.msra.mxu1 %v1170_v61  ;;  %v1046_v61 = vld [vmem:[%s3547_s11 + $0x288] sm:$0xff] }
 0x3c6   :  { %1335 = vmatprep.subr.mxu1 %v1164_v62  ;;  %v1048_v62 = vld [vmem:[%s3547_s11 + $0x298] sm:$0xff] }
 0x3c7   :  { %1336 = vmatpush2.msra.mxu1 %v1163_v63  ;;  %v1040_v63 = vld [vmem:[%s3547_s11 + $0x258] sm:$0xff] }
 0x3c8   :  { %1337 = vmatprep.subr.mxu1 %v1157_v0  ;;  %v1153_v0 = vld [vmem:[%s3547_s11 + $0x5e0] sm:$0xff] }
 0x3c9   :  { %1338 = vmatpush2.msra.mxu1 %v1156_v1  ;;  %v1039_v1 = vld [vmem:[%s3547_s11 + $0x250] sm:$0xff] }
 0x3ca   :  { %1339 = vmatprep.subr.mxu1 %v1150_v2  ;;  %v1041_v2 = vld [vmem:[%s3547_s11 + $0x260] sm:$0xff] }
 0x3cb   :  { %1340 = vmatpush2.msra.mxu1 %v1149_v3  ;;  %v1033_v3 = vld [vmem:[%s3547_s11 + $0x220] sm:$0xff] }
 0x3cc   :  { %1341 = vmatprep.subr.mxu1 %v1143_v4  ;;  %v1146_v4 = vld [vmem:[%s3547_s11 + $0x5a8] sm:$0xff] }
 0x3cd   :  { %1342 = vmatpush2.msra.mxu1 %v1142_v5  ;;  %v1032_v5 = vld [vmem:[%s3547_s11 + $0x218] sm:$0xff] }
 0x3ce   :  { %1343 = vmatprep.subr.mxu1 %v1136_v6  ;;  %v1034_v6 = vld [vmem:[%s3547_s11 + $0x228] sm:$0xff] }
 0x3cf   :  { %1344 = vmatpush2.msra.mxu1 %v1135_v7  ;;  %v1026_v7 = vld [vmem:[%s3547_s11 + $0x1e8] sm:$0xff] }
 0x3d0   :  { %1345 = vmatprep.subr.mxu1 %v1129_v8  ;;  %v1139_v8 = vld [vmem:[%s3547_s11 + $0x570] sm:$0xff] }
 0x3d1   :  { %1346 = vmatpush2.msra.mxu1 %v1128_v9  ;;  %v1025_v9 = vld [vmem:[%s3547_s11 + $0x1e0] sm:$0xff] }
 0x3d2   :  { %1347 = vmatprep.subr.mxu1 %v1122_v10  ;;  %v1027_v10 = vld [vmem:[%s3547_s11 + $0x1f0] sm:$0xff] }
 0x3d3   :  { %1348 = vmatpush2.msra.mxu1 %v1121_v11  ;;  %v1019_v11 = vld [vmem:[%s3547_s11 + $0x1b0] sm:$0xff] }
 0x3d4   :  { %1349 = vmatprep.subr.mxu1 %v1115_v12  ;;  %v1132_v12 = vld [vmem:[%s3547_s11 + $0x538] sm:$0xff] }
 0x3d5   :  { %1350 = vmatpush2.msra.mxu1 %v1114_v13  ;;  %v1018_v13 = vld [vmem:[%s3547_s11 + $0x1a8] sm:$0xff] }
 0x3d6   :  { %1351 = vmatprep.subr.mxu1 %v1108_v14  ;;  %v1020_v14 = vld [vmem:[%s3547_s11 + $0x1b8] sm:$0xff] }
 0x3d7   :  { %1352 = vmatpush2.msra.mxu1 %v1107_v15  ;;  %v1012_v15 = vld [vmem:[%s3547_s11 + $0x178] sm:$0xff] }
 0x3d8   :  { %1353 = vmatprep.subr.mxu1 %v1101_v16  ;;  %v1125_v16 = vld [vmem:[%s3547_s11 + $0x500] sm:$0xff] }
 0x3d9   :  { %1354 = vmatpush2.msra.mxu1 %v1100_v18  ;;  %v1013_v18 = vld [vmem:[%s3547_s11 + $0x180] sm:$0xff] }
 0x3da   :  { %1355 = vmatprep.subr.mxu1 %v1094_v20  ;;  %v1118_v20 = vld [vmem:[%s3547_s11 + $0x4c8] sm:$0xff] }
 0x3db   :  { %1356 = vmatpush2.msra.mxu1 %v1093_v23  ;;  %v1006_v23 = vld [vmem:[%s3547_s11 + $0x148] sm:$0xff] }
 0x3dc   :  { %1357 = vmatprep.subr.mxu1 %v1087_v25  ;;  %v1111_v25 = vld [vmem:[%s3547_s11 + $0x490] sm:$0xff] }
 0x3dd   :  { %1358 = vmatpush2.msra.mxu1 %v1086_v27  ;;  %v999_v27 = vld [vmem:[%s3547_s11 + $0x110] sm:$0xff] }
 0x3de   :  { %1359 = vmatprep.subr.mxu1 %v1080_v29  ;;  %v1104_v29 = vld [vmem:[%s3547_s11 + $0x458] sm:$0xff] }
 0x3df   :  { %1360 = vmatpush2.msra.mxu1 %v1079_v31  ;;  %v992_v31 = vld [vmem:[%s3547_s11 + $0xd8] sm:$0xff] }
 0x3e0   :  { %1652 = vmatprep.subr.mxu1 %v1188_v33  ;;  %v1097_v33 = vld [vmem:[%s3547_s11 + $0x420] sm:$0xff] }
 0x460   :  { %v958_v37 = vpop.f32.mrf.mxu1 }
 0x461   :  { %v959_v38 = vadd.f32 %v958_v37, %v885_v35  ;;  %v985_v35 = vld [vmem:[%s3547_s11 + $0xa0] sm:$0xff]  ;;  %v1090_v37 = vld [vmem:[%s3547_s11 + $0x3e8] sm:$0xff] }
 0x462   :  { %v960_v39 = vpop.f32.mrf.mxu1 }
 0x463   :  { %v961_v40 = vadd.f32 %v960_v39, %v889_v36  ;;  %v3234_v42 = vmax.f32 %v959_v38, 0.0  ;;  %v977_v36 = vld [vmem:[%s3547_s11 + $0x60] sm:$0xff]  ;;  %v976_v38 = vld [vmem:[%s3547_s11 + $0x58] sm:$0xff]  ;;  %v978_v39 = vld [vmem:[%s3547_s11 + $0x68] sm:$0xff] }
 0x465   :  { %v964_v41 = vmax.f32 %v961_v40, 0.0  ;;  %v970_v40 = vld [vmem:[%s3547_s11 + $0x28] sm:$0xff] }
 0x467   :  { %1290 = vmatprep.mubr.f32.mxu0 %v964_v41  ;;  %1361 = vmatprep.mubr.f32.mxu1 %v964_v41 }
 0x468   :  { %1291 = vmatmul.mubr.f32.vlgmr.msra.gmra.mxu0 %v3234_v42  ;;  %1362 = vmatmul.mubr.f32.vlgmr.msra.gmra.mxu1 %v3234_v42 }
 0x469   :  { %1369 = vmatpush1.msra.mxu0 %v1074_v43  ;;  %1653 = vmatpush3.msra.mxu1 %v1076_v44  ;;  %v969_v43 = vld [vmem:[%s3547_s11 + $0x20] sm:$0xff]  ;;  %v971_v44 = vld [vmem:[%s3547_s11 + $0x30] sm:$0xff] }
 0x46a   :  { %1370 = vmatprep.subr.mxu0 %v1068_v45  ;;  %1432 = vmatprep.mubr.f32.mxu0 %v964_v41  ;;  %v1187_v45 = vld [vmem:[%s3547_s11 + $0x6f0] sm:$0xff] }
 0x46b   :  { %1654 = vmatprep.subr.mxu1 %v1181_v48  ;;  %1503 = vmatprep.mubr.f32.mxu1 %v964_v41  ;;  %v1083_v41 = vld [vmem:[%s3547_s11 + $0x3b0] sm:$0xff]  ;;  %v1186_v48 = vld [vmem:[%s3547_s11 + $0x6e8] sm:$0xff] }
 0x46c   :  { %1371 = vmatpush1.msra.mxu0 %v1067_v50  ;;  %1655 = vmatpush3.msra.mxu1 %v1069_v22  ;;  %v1180_v50 = vld [vmem:[%s3547_s11 + $0x6b8] sm:$0xff]  ;;  %v1179_v22 = vld [vmem:[%s3547_s11 + $0x6b0] sm:$0xff] }
 0x46d   :  { %1372 = vmatprep.subr.mxu0 %v1061_v51  ;;  %1656 = vmatprep.subr.mxu1 %v1174_v52  ;;  %v1173_v51 = vld [vmem:[%s3547_s11 + $0x680] sm:$0xff]  ;;  %v1172_v52 = vld [vmem:[%s3547_s11 + $0x678] sm:$0xff] }
 0x46e   :  { %1373 = vmatpush1.msra.mxu0 %v1060_v53  ;;  %1657 = vmatpush3.msra.mxu1 %v1062_v54  ;;  %v1166_v53 = vld [vmem:[%s3547_s11 + $0x648] sm:$0xff]  ;;  %v1165_v54 = vld [vmem:[%s3547_s11 + $0x640] sm:$0xff] }
 0x46f   :  { %1374 = vmatprep.subr.mxu0 %v1054_v55  ;;  %1658 = vmatprep.subr.mxu1 %v1167_v56  ;;  %v1159_v55 = vld [vmem:[%s3547_s11 + $0x610] sm:$0xff]  ;;  %v1158_v56 = vld [vmem:[%s3547_s11 + $0x608] sm:$0xff] }
 0x470   :  { %1375 = vmatpush1.msra.mxu0 %v1053_v57  ;;  %1659 = vmatpush3.msra.mxu1 %v1055_v58  ;;  %v1152_v57 = vld [vmem:[%s3547_s11 + $0x5d8] sm:$0xff]  ;;  %v1151_v58 = vld [vmem:[%s3547_s11 + $0x5d0] sm:$0xff] }
 0x471   :  { %1376 = vmatprep.subr.mxu0 %v1047_v59  ;;  %1660 = vmatprep.subr.mxu1 %v1160_v60  ;;  %v1145_v59 = vld [vmem:[%s3547_s11 + $0x5a0] sm:$0xff]  ;;  %v1144_v60 = vld [vmem:[%s3547_s11 + $0x598] sm:$0xff] }
 0x472   :  { %1377 = vmatpush1.msra.mxu0 %v1046_v61  ;;  %1661 = vmatpush3.msra.mxu1 %v1048_v62  ;;  %v1138_v61 = vld [vmem:[%s3547_s11 + $0x568] sm:$0xff]  ;;  %v1137_v62 = vld [vmem:[%s3547_s11 + $0x560] sm:$0xff] }
 0x473   :  { %1378 = vmatprep.subr.mxu0 %v1040_v63  ;;  %1662 = vmatprep.subr.mxu1 %v1153_v0  ;;  %v1131_v63 = vld [vmem:[%s3547_s11 + $0x530] sm:$0xff]  ;;  %v1130_v0 = vld [vmem:[%s3547_s11 + $0x528] sm:$0xff] }
 0x474   :  { %1379 = vmatpush1.msra.mxu0 %v1039_v1  ;;  %1663 = vmatpush3.msra.mxu1 %v1041_v2  ;;  %v1124_v1 = vld [vmem:[%s3547_s11 + $0x4f8] sm:$0xff]  ;;  %v1123_v2 = vld [vmem:[%s3547_s11 + $0x4f0] sm:$0xff] }
 0x475   :  { %1380 = vmatprep.subr.mxu0 %v1033_v3  ;;  %1664 = vmatprep.subr.mxu1 %v1146_v4  ;;  %v1117_v3 = vld [vmem:[%s3547_s11 + $0x4c0] sm:$0xff]  ;;  %v1116_v4 = vld [vmem:[%s3547_s11 + $0x4b8] sm:$0xff] }
 0x476   :  { %1381 = vmatpush1.msra.mxu0 %v1032_v5  ;;  %1665 = vmatpush3.msra.mxu1 %v1034_v6  ;;  %v1110_v5 = vld [vmem:[%s3547_s11 + $0x488] sm:$0xff]  ;;  %v1109_v6 = vld [vmem:[%s3547_s11 + $0x480] sm:$0xff] }
 0x477   :  { %1382 = vmatprep.subr.mxu0 %v1026_v7  ;;  %1666 = vmatprep.subr.mxu1 %v1139_v8  ;;  %v1103_v7 = vld [vmem:[%s3547_s11 + $0x450] sm:$0xff]  ;;  %v1102_v8 = vld [vmem:[%s3547_s11 + $0x448] sm:$0xff] }
 0x478   :  { %1383 = vmatpush1.msra.mxu0 %v1025_v9  ;;  %1667 = vmatpush3.msra.mxu1 %v1027_v10  ;;  %v1096_v9 = vld [vmem:[%s3547_s11 + $0x418] sm:$0xff]  ;;  %v1095_v10 = vld [vmem:[%s3547_s11 + $0x410] sm:$0xff] }
 0x479   :  { %1384 = vmatprep.subr.mxu0 %v1019_v11  ;;  %1668 = vmatprep.subr.mxu1 %v1132_v12  ;;  %v1089_v11 = vld [vmem:[%s3547_s11 + $0x3e0] sm:$0xff]  ;;  %v1088_v12 = vld [vmem:[%s3547_s11 + $0x3d8] sm:$0xff] }
 0x47a   :  { %1385 = vmatpush1.msra.mxu0 %v1018_v13  ;;  %1669 = vmatpush3.msra.mxu1 %v1020_v14  ;;  %v1082_v13 = vld [vmem:[%s3547_s11 + $0x3a8] sm:$0xff]  ;;  %v1081_v14 = vld [vmem:[%s3547_s11 + $0x3a0] sm:$0xff]  ;;  %s1812_s11 = smov [#allocation2]  }
 0x47b   :  { %1386 = vmatprep.subr.mxu0 %v1012_v15  ;;  %1670 = vmatprep.subr.mxu1 %v1125_v16  ;;  %v1201_v15 = vsub.s32 2, %v2592_v46  ;;  %v1189_v16 = vld [vmem:[%s3548_s12] sm:$0x7f]  ;;  %s1564_s12 = sshll.u32 %s1812_s11, 4  ;;  %s1565_s12 = int_to_ptr.vmem [resolvable:$true] %s1564_s12 }
 0x47c   :  { %1387 = vmatpush1.msra.mxu0 %v1011_v17  ;;  %1671 = vmatpush3.msra.mxu1 %v1013_v18  ;;  %v1205_v17 = vsub.s32 3, %v2592_v46  ;;  %v1194_v18 = vrot.slane %v1189_v16, %v2595_v47  ;;  %s1788_s21 = scalar_lea.vmem %s1565_s12, 896  ;;  %p1793_p1 = scmp.lt.s32.totalorder %s1565_s12, %s1565_s12 }
 0x47d   :  { %1388 = vmatprep.subr.mxu0 %v1005_v19  ;;  %1672 = vmatprep.subr.mxu1 %v1118_v20  ;;  %v1202_v19 = vrot.slane %v1189_v16, %v1201_v15  ;;  %v1198_v20 = vrot.slane %v1189_v16, %v2601_v49  ;;  %p1789_p0 = scmp.ne.s32.totalorder %s1565_s12, %s1788_s21  ;;  %p1794_p2 = scmp.lt.s32.totalorder %s1788_s21, %s1788_s21 }
 0x47e   :  { %1389 = vmatpush1.msra.mxu0 %v1004_v21  ;;  %1673 = vmatpush3.msra.mxu1 %v1006_v23  ;;  %v1206_v21 = vrot.slane %v1189_v16, %v1205_v17 }
 0x47f   :  { %1390 = vmatprep.subr.mxu0 %v998_v24  ;;  %1674 = vmatprep.subr.mxu1 %v1111_v25  ;;  %p1795_p3 = por %p1794_p2, %p1793_p1 }
 0x480   :  { %1391 = vmatpush1.msra.mxu0 %v997_v26  ;;  %1675 = vmatpush3.msra.mxu1 %v999_v27 }
 0x481   :  { %1392 = vmatprep.subr.mxu0 %v991_v28  ;;  %1676 = vmatprep.subr.mxu1 %v1104_v29  ;;  %p1796_p4 = pnand %p1795_p3, %p1789_p0 }
 0x482   :  { %1393 = vmatpush1.msra.mxu0 %v990_v30  ;;  %1677 = vmatpush3.msra.mxu1 %v992_v31 }
 0x483   :  { %1394 = vmatprep.subr.mxu0 %v984_v32  ;;  %1678 = vmatprep.subr.mxu1 %v1097_v33 }
 0x484   :  { %1395 = vmatpush1.msra.mxu0 %v983_v34  ;;  %1679 = vmatpush3.msra.mxu1 %v985_v35 }
 0x485   :  { %1396 = vmatprep.subr.mxu0 %v977_v36  ;;  %1680 = vmatprep.subr.mxu1 %v1090_v37 }
 0x486   :  { %1397 = vmatpush1.msra.mxu0 %v976_v38  ;;  %1681 = vmatpush3.msra.mxu1 %v978_v39 }
 0x487   :  { %1398 = vmatprep.subr.mxu0 %v970_v40  ;;  %1682 = vmatprep.subr.mxu1 %v1083_v41  ;;  %v1217_v40 = vsub.s32 6, %v2592_v46 }
 0x488   :  { %1399 = vmatpush1.msra.mxu0 %v969_v43  ;;  %1683 = vmatpush3.msra.mxu1 %v971_v44 }
 0x489   :  { %1400 = vmatprep.subr.mxu0 %v1187_v45  ;;  %1504 = vmatmul.mubr.f32.vlgmr.msra.gmra.mxu1 %v3234_v42  ;;  %v1218_v44 = vrot.slane %v1189_v16, %v1217_v40 }
 0x48a   :  { %1401 = vmatpush2.msra.mxu0 %v1186_v48 }
 0x48b   :  { %1402 = vmatprep.subr.mxu0 %v1180_v50 }
 0x48c   :  { %1403 = vmatpush2.msra.mxu0 %v1179_v22 }
 0x48d   :  { %1404 = vmatprep.subr.mxu0 %v1173_v51 }
 0x48e   :  { %1405 = vmatpush2.msra.mxu0 %v1172_v52 }
 0x48f   :  { %1406 = vmatprep.subr.mxu0 %v1166_v53 }
 0x490   :  { %1407 = vmatpush2.msra.mxu0 %v1165_v54 }
 0x491   :  { %1408 = vmatprep.subr.mxu0 %v1159_v55 }
 0x492   :  { %1409 = vmatpush2.msra.mxu0 %v1158_v56  ;;  %v1209_v56 = vsub.s32 4, %v2592_v46 }
 0x493   :  { %1410 = vmatprep.subr.mxu0 %v1152_v57  ;;  %v1213_v57 = vsub.s32 5, %v2592_v46 }
 0x494   :  { %1411 = vmatpush2.msra.mxu0 %v1151_v58  ;;  %v1210_v58 = vrot.slane %v1189_v16, %v1209_v56 }
 0x495   :  { %1412 = vmatprep.subr.mxu0 %v1145_v59  ;;  %v1214_v59 = vrot.slane %v1189_v16, %v1213_v57 }
 0x496   :  { %1413 = vmatpush2.msra.mxu0 %v1144_v60 }
 0x497   :  { %1414 = vmatprep.subr.mxu0 %v1138_v61 }
 0x498   :  { %1415 = vmatpush2.msra.mxu0 %v1137_v62 }
 0x499   :  { %1416 = vmatprep.subr.mxu0 %v1131_v63 }
 0x49a   :  { %1417 = vmatpush2.msra.mxu0 %v1130_v0 }
 0x49b   :  { %1418 = vmatprep.subr.mxu0 %v1124_v1 }
 0x49c   :  { %1419 = vmatpush2.msra.mxu0 %v1123_v2 }
 0x49d   :  { %1420 = vmatprep.subr.mxu0 %v1117_v3 }
 0x49e   :  { %1421 = vmatpush2.msra.mxu0 %v1116_v4 }
 0x49f   :  { %1422 = vmatprep.subr.mxu0 %v1110_v5 }
 0x4a0   :  { %1423 = vmatpush2.msra.mxu0 %v1109_v6 }
 0x4a1   :  { %1424 = vmatprep.subr.mxu0 %v1103_v7 }
 0x4a2   :  { %1425 = vmatpush2.msra.mxu0 %v1102_v8 }
 0x4a3   :  { %1426 = vmatprep.subr.mxu0 %v1096_v9 }
 0x4a4   :  { %1427 = vmatpush2.msra.mxu0 %v1095_v10 }
 0x4a5   :  { %1428 = vmatprep.subr.mxu0 %v1089_v11 }
 0x4a6   :  { %1429 = vmatpush2.msra.mxu0 %v1088_v12 }
 0x4a7   :  { %1430 = vmatprep.subr.mxu0 %v1082_v13 }
 0x4a8   :  { %1431 = vmatpush2.msra.mxu0 %v1081_v14 }
 0x4a9   :  { %1433 = vmatmul.mubr.f32.vlgmr.msra.gmra.mxu0 %v3234_v42 }
 0x528   :  { %v1292_v23 = vpop.f32.mrf.mxu0  ;;  %v1363_v24 = vpop.f32.mrf.mxu1 }
 0x529   :  { %v1293_v25 = vadd.f32 %v1292_v23, %v1194_v18  ;;  %v1364_v26 = vadd.f32 %v1363_v24, %v1202_v19 }
 0x52a   :  { %v1294_v27 = vpop.f32.mrf.mxu0  ;;  %v1365_v42 = vpop.f32.mrf.mxu1 }
 0x52b   :  { %v1576_v28 = vmul.f32 -1.442695, %v1293_v25  ;;  %v1578_v29 = vmul.f32 -1.442695, %v1364_v26  ;;  %v1295_v30 = vadd.f32 %v1294_v27, %v1198_v20  ;;  %v1366_v31 = vadd.f32 %v1365_v42, %v1206_v21 }
 0x52d   :  { %1760 = vpow2.f32 %v1576_v28  ;;  %v1577_v32 = vmul.f32 -1.442695, %v1295_v30  ;;  %v1579_v33 = vmul.f32 -1.442695, %v1366_v31 }
 0x52e   :  { %1762 = vpow2.f32 %v1578_v29 }
 0x52f   :  { %1764 = vpow2.f32 %v1577_v32 }
 0x530   :  { %1766 = vpow2.f32 %v1579_v33 }
 0x53a   :  { %v1761_v47 = vpop.eup %1760 }
 0x53b   :  { %v1763_v34 = vpop.eup %1762  ;;  %v1530_v49 = vadd.f32 1.0, %v1761_v47 }
 0x53c   :  { %v1765_v35 = vpop.eup %1764  ;;  %v1532_v36 = vadd.f32 1.0, %v1763_v34 }
 0x53d   :  { %v1767_v37 = vpop.eup %1766  ;;  %1768 = vrcp.f32 %v1530_v49  ;;  %v1531_v38 = vadd.f32 1.0, %v1765_v35 }
 0x53e   :  { %1770 = vrcp.f32 %v1532_v36  ;;  %v1533_v39 = vadd.f32 1.0, %v1767_v37 }
 0x53f   :  { %1772 = vrcp.f32 %v1531_v38 }
 0x540   :  { %1774 = vrcp.f32 %v1533_v39 }
 0x549   :  { %v1684_v41 = vpop.f32.mrf.mxu1 }
 0x54a   :  { %v1769_v43 = vpop.eup %1768 }
 0x54b   :  { %v1771_v45 = vpop.eup %1770  ;;  %1551 = vst [vmem:[#allocation2] sm:$0xff] %v1769_v43  ;;  %v1685_v48 = vpop.f32.mrf.mxu1 }
 0x54c   :  { %v1773_v50 = vpop.eup %1772  ;;  %1553 = vst [vmem:[#allocation2 + $0x10] sm:$0xff] %v1771_v45  ;;  %v1686_v22 = vadd.f32 %v1685_v48, %v1684_v41 }
 0x54d   :  { %v1775_v51 = vpop.eup %1774  ;;  %1552 = vst [vmem:[#allocation2 + $0x8] sm:$0xff] %v1773_v50 }
 0x54e   :  { %1554 = vst [vmem:[#allocation2 + $0x18] sm:$0xff] %v1775_v51  ;;  %v1506_v52 = vadd.f32 %v1686_v22, %v1218_v44 }
 0x550   :  { %v1582_v53 = vmul.f32 -1.442695, %v1506_v52 }
 0x552   :  { %1776 = vpow2.f32 %v1582_v53 }
 0x55f   :  { %v1777_v54 = vpop.eup %1776 }
 0x560   :  { %v1536_v55 = vadd.f32 1.0, %v1777_v54 }
 0x562   :  { %1778 = vrcp.f32 %v1536_v55 }
 0x569   :  { %v1434_v60 = vpop.f32.mrf.mxu0 }
 0x56a   :  { %v1435_v61 = vadd.f32 %v1434_v60, %v1210_v58 }
 0x56b   :  { %v1436_v62 = vpop.f32.mrf.mxu0 }
 0x56c   :  { %v1580_v63 = vmul.f32 -1.442695, %v1435_v61  ;;  %v1437_v0 = vadd.f32 %v1436_v62, %v1214_v59 }
 0x56e   :  { %1780 = vpow2.f32 %v1580_v63  ;;  %v1581_v1 = vmul.f32 -1.442695, %v1437_v0 }
 0x56f   :  { %v1779_v2 = vpop.eup %1778 }
 0x570   :  { %1557 = vst.msk [vmem:[#allocation2 + $0x30] sm:$0xff] %vm260_vm0, %v1779_v2  ;;  %1782 = vpow2.f32 %v1581_v1 }
 0x57b   :  { %v1781_v3 = vpop.eup %1780 }
 0x57c   :  { %v1534_v4 = vadd.f32 1.0, %v1781_v3 }
 0x57d   :  { %v1783_v5 = vpop.eup %1782 }
 0x57e   :  { %1784 = vrcp.f32 %v1534_v4  ;;  %v1535_v6 = vadd.f32 1.0, %v1783_v5 }
 0x580   :  { %1786 = vrcp.f32 %v1535_v6 }
 0x58b   :  { %v1785_v46 = vpop.eup %1784 }
 0x58c   :  { %1555 = vst [vmem:[#allocation2 + $0x20] sm:$0xff] %v1785_v46 }
 0x58d   :  { %v1787_v7 = vpop.eup %1786 }
 0x58e   :  { %1556 = vst [vmem:[#allocation2 + $0x28] sm:$0xff] %v1787_v7 }
 0x58f   :  { %1799 = shalt.err (!%p1796_p4)
}
 0x590   :  { %1567 = dma.vmem_to_hbm [thread:$0]  %s1565_s12, 896, %s3549_s13, [#allocation3]  }
 0x591   :  { %1808 = dma.done.wait [#allocation3], 896  }
 0x592   :  { %1809 = vsyncadd [#allocation3], 4294966400 }
 0x593   :  { %1571 = vsyncpa [#allocation3], 1 }

</bundles_post_ra>
